<compile_context>
chip_gen: v6e
topology: v6e:2x2x1
jax: 0.10.0
libtpu: 0.0.40
codegen_flags: <defaults>
</compile_context>

<pallas_src>
import functools

import jax
import jax.numpy as jnp
from jax.experimental import pallas as pl
from jax.experimental.pallas import tpu as pltpu


# ----------------------------------------------------------------------------
# Small helpers
# ----------------------------------------------------------------------------
def _apply_act(y, act):
    if act == "leaky":
        return jnp.where(y > 0, y, 0.01 * y)       # nn.LeakyReLU(0.01)
    if act == "quick_gelu":
        return y * jax.nn.sigmoid(1.702 * y)       # CLIP QuickGELU
    return y


def _ln_val(x, g, b, eps=1e-5):
    mu = jnp.mean(x, axis=-1, keepdims=True)
    var = jnp.mean((x - mu) ** 2, axis=-1, keepdims=True)
    return (x - mu) * jax.lax.rsqrt(var + eps) * g + b


def _full_spec(shape):
    zeros = (0,) * len(shape)
    return pl.BlockSpec(shape, lambda i, _z=zeros: _z)


def nchw_to_nhwc(x):
    return jnp.transpose(x, (0, 2, 3, 1))


def nhwc_to_nchw(x):
    return jnp.transpose(x, (0, 3, 1, 2))


# ----------------------------------------------------------------------------
# Fused text-encoder kernel: grid = (batch, layer)
#   residual stream resident in VMEM scratch across layers,
#   fused QKV / output-projection matmuls,
#   final LN + EOT pooling + text projection fused into the last step.
# ----------------------------------------------------------------------------
def _text_encoder_kernel(x0_ref, ln1g_ref, ln1b_ref, qkvw_ref, qkvb_ref,
                         projw_ref, projb_ref, ln2g_ref, ln2b_ref,
                         fc1w_ref, fc1b_ref, fc2w_ref, fc2b_ref,
                         lnfg_ref, lnfb_ref, eot_ref, tproj_ref,
                         feats_ref, x_scr, *, L, W, H):
    l = pl.program_id(1)
    Dh = W // H
    scale = 1.0 / float(Dh) ** 0.5

    @pl.when(l == 0)
    def _init():
        x_scr[...] = x0_ref[0]

    x = x_scr[...]                                              # (L, W) f32

    # ---- attention: LN1 -> fused QKV matmul -> per-head softmax -> fused proj
    xn = _ln_val(x, ln1g_ref[0], ln1b_ref[0]).astype(jnp.bfloat16)
    qkv = jnp.dot(xn, qkvw_ref[0],
                  preferred_element_type=jnp.float32) + qkvb_ref[0]  # (L, 3W)

    row = jax.lax.broadcasted_iota(jnp.int32, (L, L), 0)
    col = jax.lax.broadcasted_iota(jnp.int32, (L, L), 1)
    neg = jnp.where(col > row, -1e9, 0.0).astype(jnp.float32)   # causal mask

    head_outs = []
    for h in range(H):                      # softmax math only; matmuls fused
        q = qkv[:, h * Dh:(h + 1) * Dh].astype(jnp.bfloat16)
        k = qkv[:, W + h * Dh:W + (h + 1) * Dh].astype(jnp.bfloat16)
        v = qkv[:, 2 * W + h * Dh:2 * W + (h + 1) * Dh].astype(jnp.bfloat16)
        s = jax.lax.dot_general(q, k, (((1,), (1,)), ((), ())),
                                preferred_element_type=jnp.float32)
        s = s * scale + neg
        s = s - jnp.max(s, axis=-1, keepdims=True)
        p = jnp.exp(s)
        p = p * pl.reciprocal(jnp.sum(p, axis=-1, keepdims=True), approx=True)
        head_outs.append(jnp.dot(p.astype(jnp.bfloat16), v,
                                 preferred_element_type=jnp.float32))
    attn = jnp.concatenate(head_outs, axis=-1).astype(jnp.bfloat16)  # (L, W)
    x = x + jnp.dot(attn, projw_ref[0],
                    preferred_element_type=jnp.float32) + projb_ref[0]

    # ---- MLP: LN2 -> FC1 -> QuickGELU -> FC2 -> residual
    xn2 = _ln_val(x, ln2g_ref[0], ln2b_ref[0]).astype(jnp.bfloat16)
    hmid = jnp.dot(xn2, fc1w_ref[0],
                   preferred_element_type=jnp.float32) + fc1b_ref[0]
    hmid = hmid * jax.nn.sigmoid(1.702 * hmid)
    x = x + jnp.dot(hmid.astype(jnp.bfloat16), fc2w_ref[0],
                    preferred_element_type=jnp.float32) + fc2b_ref[0]
    x_scr[...] = x

    # ---- final LN + exact EOT pooling + text projection (fused epilogue)
    @pl.when(l == pl.num_programs(1) - 1)
    def _fin():
        xf = _ln_val(x, lnfg_ref[...], lnfb_ref[...])           # (L, W)
        pooled = jnp.sum(xf * eot_ref[0], axis=0, keepdims=True)  # (1, W)
        feats_ref[0] = jnp.dot(pooled.astype(jnp.bfloat16), tproj_ref[...],
                               preferred_element_type=jnp.float32)


def text_encoder_forward(p, tokens):
    B, L = tokens.shape
    W = p["tok_emb"].shape[1]
    E = p["text_proj"].shape[1]
    nl = p["qkv_w"].shape[0]
    H = p["heads"]

    # TODO(synk): token-embedding gather and EOT argmax remain in XLA
    # (data-dependent gather; no clean whole-array Pallas equivalent here).
    x0 = (p["tok_emb"][tokens] + p["pos_emb"][None, :L, :]).astype(jnp.float32)
    eot = jnp.argmax(tokens, axis=-1)     # synthetic stand-in for real EOT id
    onehot = (jnp.arange(L)[None, :] == eot[:, None]
              ).astype(jnp.float32)[:, :, None]                # (B, L, 1)

    kernel = functools.partial(_text_encoder_kernel, L=L, W=W, H=H)
    feats = pl.pallas_call(
        kernel,
        grid=(B, nl),
        in_specs=[
            pl.BlockSpec((1, L, W), lambda b, l: (b, 0, 0)),       # x0
            pl.BlockSpec((1, 1, W), lambda b, l: (l, 0, 0)),       # ln1_g
            pl.BlockSpec((1, 1, W), lambda b, l: (l, 0, 0)),       # ln1_b
            pl.BlockSpec((1, W, 3 * W), lambda b, l: (l, 0, 0)),   # qkv_w
            pl.BlockSpec((1, 1, 3 * W), lambda b, l: (l, 0, 0)),   # qkv_b
            pl.BlockSpec((1, W, W), lambda b, l: (l, 0, 0)),       # proj_w
            pl.BlockSpec((1, 1, W), lambda b, l: (l, 0, 0)),       # proj_b
            pl.BlockSpec((1, 1, W), lambda b, l: (l, 0, 0)),       # ln2_g
            pl.BlockSpec((1, 1, W), lambda b, l: (l, 0, 0)),       # ln2_b
            pl.BlockSpec((1, W, 4 * W), lambda b, l: (l, 0, 0)),   # fc1_w
            pl.BlockSpec((1, 1, 4 * W), lambda b, l: (l, 0, 0)),   # fc1_b
            pl.BlockSpec((1, 4 * W, W), lambda b, l: (l, 0, 0)),   # fc2_w
            pl.BlockSpec((1, 1, W), lambda b, l: (l, 0, 0)),       # fc2_b
            pl.BlockSpec((1, W), lambda b, l: (0, 0)),             # lnf_g
            pl.BlockSpec((1, W), lambda b, l: (0, 0)),             # lnf_b
            pl.BlockSpec((1, L, 1), lambda b, l: (b, 0, 0)),       # eot onehot
            pl.BlockSpec((W, E), lambda b, l: (0, 0)),             # text_proj
        ],
        out_specs=pl.BlockSpec((1, 1, E), lambda b, l: (b, 0, 0)),
        out_shape=jax.ShapeDtypeStruct((B, 1, E), jnp.float32),
        scratch_shapes=[pltpu.VMEM((L, W), jnp.float32)],
        compiler_params=pltpu.CompilerParams(
            dimension_semantics=("parallel", "arbitrary")),
    )(x0, p["ln1_g"], p["ln1_b"], p["qkv_w"], p["qkv_b"],
      p["proj_w"], p["proj_b"], p["ln2_g"], p["ln2_b"],
      p["fc1_w"], p["fc1_b"], p["fc2_w"], p["fc2_b"],
      p["lnf_g"], p["lnf_b"], onehot, p["text_proj"])
    return feats.reshape(B, E)


# ----------------------------------------------------------------------------
# 3x3 conv kernel: padded input read ONCE, 9 in-kernel tap slices accumulated
# into an f32 accumulator (no im2col); fused bias/activation/post-affine.
# ----------------------------------------------------------------------------
def _conv3x3_kernel(x_ref, w_ref, b_ref, o_ref, *, G, Wp, act, post_affine,
                    post_act):
    Cout = w_ref.shape[2]
    x = x_ref[0].astype(jnp.bfloat16)                   # (Hp*Wp+2, Cin)
    acc = jnp.zeros((G, Cout), jnp.float32)
    t = 0
    for di in range(3):
        for dj in range(3):
            off = di * Wp + dj
            acc = acc + jnp.dot(x[off:off + G, :], w_ref[t],
                                preferred_element_type=jnp.float32)
            t += 1
    y = acc + b_ref[...]
    y = _apply_act(y, act)
    if post_affine is not None:
        y = y * post_affine[0] + post_affine[1]
    y = _apply_act(y, post_act)
    o_ref[0] = y.astype(o_ref.dtype)


def conv3x3(x_nhwc, p, *, stride=1, act="none", post_affine=None,
            post_act="none", out_dtype=jnp.float32):
    """3x3 conv, padding=1.  p = dict(w=(9,Cin,Cout) bf16, b=(1,Cout) f32, pad)."""
    B, H, W_, Cin = x_nhwc.shape
    Cout = p["w"].shape[2]
    Hp, Wp = H + 2, W_ + 2
    G = H * Wp                                          # stride-1 output rows

    xp = jnp.pad(x_nhwc, ((0, 0), (1, 1), (1, 1), (0, 0)),
                 constant_values=p["pad"])
    xflat = xp.reshape(B, Hp * Wp, Cin)
    xflat = jnp.pad(xflat, ((0, 0), (0, 2), (0, 0)))    # tap overrun rows

    out = pl.pallas_call(
        functools.partial(_conv3x3_kernel, G=G, Wp=Wp, act=act,
                          post_affine=post_affine, post_act=post_act),
        grid=(B,),
        in_specs=[
            pl.BlockSpec((1, Hp * Wp + 2, Cin), lambda b: (b, 0, 0)),
            pl.BlockSpec((9, Cin, Cout), lambda b: (0, 0, 0)),
            pl.BlockSpec((1, Cout), lambda b: (0, 0)),
        ],
        out_specs=pl.BlockSpec((1, G, Cout), lambda b: (b, 0, 0)),
        out_shape=jax.ShapeDtypeStruct((B, G, Cout), out_dtype),
        compiler_params=pltpu.CompilerParams(dimension_semantics=("parallel",)),
    )(xflat, p["w"], p["b"])

    out = out.reshape(B, H, Wp, Cout)[:, :, :W_, :]     # drop wrap columns
    if stride == 2:
        # TODO(synk): stride-2 handled by computing the stride-1 result and
        # decimating in XLA; at large resolutions move the decimation
        # (phase-decomposed taps) into the kernel.
        out = out[:, ::2, ::2, :]
    return out


def upsample2(x_nhwc):
    # TODO(synk): fuse the nearest-2x upsample into the following conv's tap
    # indexing (sub-pixel phase weights) instead of materializing the 4x tensor.
    return jnp.repeat(jnp.repeat(x_nhwc, 2, axis=1), 2, axis=2)


# ----------------------------------------------------------------------------
# Tiny dense kernel (bf16 weights resident, in-kernel activation cast)
# ----------------------------------------------------------------------------
def _dense_kernel(x_ref, w_ref, b_ref, o_ref, *, act):
    y = jnp.dot(x_ref[...].astype(jnp.bfloat16), w_ref[...],
                preferred_element_type=jnp.float32) + b_ref[...]
    y = _apply_act(y, act)
    o_ref[...] = y.astype(o_ref.dtype)


def pallas_dense(x, p, act="none", out_dtype=jnp.float32):
    M, K = x.shape
    N = p["w"].shape[1]
    return pl.pallas_call(
        functools.partial(_dense_kernel, act=act),
        grid=(1,),
        in_specs=[_full_spec((M, K)), _full_spec((K, N)), _full_spec((1, N))],
        out_specs=_full_spec((M, N)),
        out_shape=jax.ShapeDtypeStruct((M, N), out_dtype),
        compiler_params=pltpu.CompilerParams(dimension_semantics=("arbitrary",)),
    )(x, p["w"], p["b"])


# ----------------------------------------------------------------------------
# Fused style-MLP + AdaIN kernel (runs directly in NHWC-flattened layout)
# ----------------------------------------------------------------------------
def _style_adain_kernel(c_ref, s_ref, w1_ref, b1_ref, w2_ref, b2_ref, o_ref,
                        *, C, eps):
    # style MLP: (B,E) -> leaky -> (B, 2C)
    s = s_ref[...].astype(jnp.bfloat16)
    hg = jnp.dot(s, w1_ref[...], preferred_element_type=jnp.float32) + b1_ref[...]
    hg = jnp.where(hg > 0, hg, 0.01 * hg)
    gb = jnp.dot(hg.astype(jnp.bfloat16), w2_ref[...],
                 preferred_element_type=jnp.float32) + b2_ref[...]
    gamma = gb[:, :C][:, None, :]                        # (B, 1, C)
    beta = gb[:, C:][:, None, :]

    # instance norm over spatial positions
    x = c_ref[...].astype(jnp.float32)                   # (B, HW, C)
    mu = jnp.mean(x, axis=1, keepdims=True)
    var = jnp.mean((x - mu) ** 2, axis=1, keepdims=True)
    xn = (x - mu) * jax.lax.rsqrt(var + eps)
    o_ref[...] = (xn * (1.0 + gamma) + beta).astype(o_ref.dtype)


def style_adain(c_nhwc, style, p, eps=1e-5, out_dtype=jnp.bfloat16):
    B, Hc, Wc, C = c_nhwc.shape
    E = style.shape[1]
    c3 = c_nhwc.reshape(B, Hc * Wc, C)
    out = pl.pallas_call(
        functools.partial(_style_adain_kernel, C=C, eps=eps),
        grid=(1,),
        in_specs=[_full_spec((B, Hc * Wc, C)), _full_spec((B, E)),
                  _full_spec((E, E)), _full_spec((1, E)),
                  _full_spec((E, 2 * C)), _full_spec((1, 2 * C))],
        out_specs=_full_spec((B, Hc * Wc, C)),
        out_shape=jax.ShapeDtypeStruct((B, Hc * Wc, C), out_dtype),
        compiler_params=pltpu.CompilerParams(dimension_semantics=("arbitrary",)),
    )(c3, style, p["mlp1"]["w"], p["mlp1"]["b"], p["mlp2"]["w"], p["mlp2"]["b"])
    return out.reshape(B, Hc, Wc, C)


# ----------------------------------------------------------------------------
# Sub-modules
# ----------------------------------------------------------------------------
def image_encoder_forward(p, x_nhwc):
    # x*2-1 is folded into c1's weights at init (pad value 0.5).
    h = conv3x3(x_nhwc, p["c1"], stride=2, act="leaky", out_dtype=jnp.bfloat16)
    h = conv3x3(h, p["c2"], stride=2, act="leaky", out_dtype=jnp.float32)
    pooled = jnp.mean(h, axis=(1, 2))
    return pallas_dense(pooled, p["fc"])


def content_encoder_forward(p, x_nhwc):
    h = conv3x3(x_nhwc, p["c1"], stride=1, act="leaky", out_dtype=jnp.bfloat16)
    h = conv3x3(h, p["c2"], stride=2, act="leaky", out_dtype=jnp.bfloat16)
    c = conv3x3(h, p["c3"], stride=2, act="leaky", out_dtype=jnp.float32)
    return c                                             # content code (f32)


def hyper_decoder_forward(p, c_nhwc, style, post_affine=None, post_act="none"):
    x = style_adain(c_nhwc, style, p)                    # bf16
    x = upsample2(x)
    x = conv3x3(x, p["d1"], act="leaky", out_dtype=jnp.bfloat16)
    x = upsample2(x)
    x = conv3x3(x, p["d2"], act="leaky", out_dtype=jnp.bfloat16)
    # act(rec*0.5+0.5) of the recon branch fused into the last conv's epilogue.
    x = conv3x3(x, p["d3"], act="none", post_affine=post_affine,
                post_act=post_act, out_dtype=jnp.float32)
    return x


def seq2seq_forward(p, x_nhwc, style_tgt, post_affine=None, post_act="none"):
    c = content_encoder_forward(p["enc"], x_nhwc)
    rec = hyper_decoder_forward(p["dec"], c, style_tgt,
                                post_affine=post_affine, post_act=post_act)
    return rec, c


# ----------------------------------------------------------------------------
# EVA forward
# ----------------------------------------------------------------------------
def eva_forward(params, x_src, x_tgt, s_src, s_tgt, recon=False):
    if recon:
        # torch.no_grad()/.detach() -> stop_gradient
        style_src = jax.lax.stop_gradient(
            text_encoder_forward(params["text"], s_src))
        style_tgt = jax.lax.stop_gradient(
            text_encoder_forward(params["text"], s_tgt))
        xs = nchw_to_nhwc(x_src)
        xt = nchw_to_nhwc(x_tgt)
        # x*2-1 folded into enc.c1 at init; act(rec*0.5+0.5) fused into dec.d3.
        rec_s2t, c_src = seq2seq_forward(params["seq2seq"], xs, style_tgt,
                                         post_affine=(0.5, 0.5),
                                         post_act="leaky")
        rec_t2s, c_tgt = seq2seq_forward(params["seq2seq"], xt, style_src,
                                         post_affine=(0.5, 0.5),
                                         post_act="leaky")
        return (nhwc_to_nchw(rec_s2t), nhwc_to_nchw(rec_t2s),
                nhwc_to_nchw(c_src), nhwc_to_nchw(c_tgt),
                style_src, style_tgt)
    else:
        xs = nchw_to_nhwc(x_src)
        image_features = image_encoder_forward(params["image"], xs)
        text_features = text_encoder_forward(params["text"], s_src)
        return image_features, text_features


# ----------------------------------------------------------------------------
# Deterministic parameter init (trunc_normal std=0.02, zero bias)
# Weights stored pre-cast (bf16) and pre-laid-out for the kernels.
# ----------------------------------------------------------------------------
class KeyGen:
    def __init__(self, key):
        self.key = key

    def __call__(self):
        self.key, k = jax.random.split(self.key)
        return k


def trunc_normal(key, shape, std=0.02):
    return std * jax.random.truncated_normal(key, -2.0, 2.0, shape, jnp.float32)


def init_params(key, cfg):
    kg = KeyGen(key)
    W = cfg["transformer_width"]
    E = cfg["embed_dim"]
    Cc = cfg["content_ch"]
    H = cfg["transformer_heads"]
    nl = cfg["transformer_layers"]

    def conv_p(cin, cout, in_affine=None):
        w = trunc_normal(kg(), (3, 3, cin, cout))
        b = jnp.zeros((cout,), jnp.float32)
        pad = 0.0
        if in_affine is not None:
            # Fold y = conv(a*x + c):  W'=a*W, b'=b+c*sum(W), pad raw x with -c/a
            a, c = in_affine
            b = b + c * jnp.sum(w, axis=(0, 1, 2))
            w = w * a
            pad = -c / a
        return dict(w=w.reshape(9, cin, cout).astype(jnp.bfloat16),
                    b=b.reshape(1, cout).astype(jnp.float32), pad=pad)

    def lin_p(cin, cout):
        return dict(w=trunc_normal(kg(), (cin, cout)).astype(jnp.bfloat16),
                    b=jnp.zeros((1, cout), jnp.float32))

    text = dict(
        heads=H,
        tok_emb=trunc_normal(kg(), (cfg["vocab_size"], W)),
        pos_emb=trunc_normal(kg(), (cfg["context_length"], W), std=0.01),
        ln1_g=jnp.ones((nl, 1, W), jnp.float32),
        ln1_b=jnp.zeros((nl, 1, W), jnp.float32),
        qkv_w=trunc_normal(kg(), (nl, W, 3 * W)).astype(jnp.bfloat16),
        qkv_b=jnp.zeros((nl, 1, 3 * W), jnp.float32),
        proj_w=trunc_normal(kg(), (nl, W, W)).astype(jnp.bfloat16),
        proj_b=jnp.zeros((nl, 1, W), jnp.float32),
        ln2_g=jnp.ones((nl, 1, W), jnp.float32),
        ln2_b=jnp.zeros((nl, 1, W), jnp.float32),
        fc1_w=trunc_normal(kg(), (nl, W, 4 * W)).astype(jnp.bfloat16),
        fc1_b=jnp.zeros((nl, 1, 4 * W), jnp.float32),
        fc2_w=trunc_normal(kg(), (nl, 4 * W, W)).astype(jnp.bfloat16),
        fc2_b=jnp.zeros((nl, 1, W), jnp.float32),
        lnf_g=jnp.ones((1, W), jnp.float32),
        lnf_b=jnp.zeros((1, W), jnp.float32),
        text_proj=trunc_normal(kg(), (W, E)).astype(jnp.bfloat16))

    image = dict(c1=conv_p(3, 8, in_affine=(2.0, -1.0)),
                 c2=conv_p(8, 16),
                 fc=lin_p(16, E))

    enc = dict(c1=conv_p(3, 8, in_affine=(2.0, -1.0)),
               c2=conv_p(8, Cc),
               c3=conv_p(Cc, Cc))

    dec = dict(mlp1=lin_p(E, E), mlp2=lin_p(E, 2 * Cc),
               d1=conv_p(Cc, Cc), d2=conv_p(Cc, 8), d3=conv_p(8, 3))

    return dict(text=text, image=image, seq2seq=dict(enc=enc, dec=dec))


# ----------------------------------------------------------------------------
if __name__ == "__main__":
    cfg = dict(embed_dim=32, context_length=8, vocab_size=64,
               transformer_heads=4, transformer_layers=2, transformer_width=32,
               content_ch=16)

    root = jax.random.PRNGKey(0)
    kp, kd = jax.random.split(root)
    params = init_params(kp, cfg)

    k1, k2, k3, k4 = jax.random.split(kd, 4)
    x_src = jax.random.uniform(k1, (2, 3, 16, 16), jnp.float32)   # NCHW like torch
    x_tgt = jax.random.uniform(k2, (2, 3, 16, 16), jnp.float32)
    s_src = jax.random.randint(k3, (2, 8), 0, cfg["vocab_size"]).astype(jnp.int32)
    s_tgt = jax.random.randint(k4, (2, 8), 0, cfg["vocab_size"]).astype(jnp.int32)

    out_recon = eva_forward(params, x_src, x_tgt, s_src, s_tgt, recon=True)
    out_feats = eva_forward(params, x_src, x_tgt, s_src, s_tgt, recon=False)

    jax.block_until_ready(out_recon)
    jax.block_until_ready(out_feats)

    # sanity on shapes (recon branch)
    assert out_recon[0].shape == (2, 3, 16, 16)
    assert out_recon[1].shape == (2, 3, 16, 16)
    assert out_recon[2].shape == (2, cfg["content_ch"], 4, 4)
    assert out_recon[3].shape == (2, cfg["content_ch"], 4, 4)
    assert out_recon[4].shape == (2, cfg["embed_dim"])
    assert out_recon[5].shape == (2, cfg["embed_dim"])
    # feature branch
    assert out_feats[0].shape == (2, cfg["embed_dim"])
    assert out_feats[1].shape == (2, cfg["embed_dim"])

    print("KERNEL_OK")
</pallas_src>

<mosaic_0001>
module attributes {stable_mosaic.version = 11 : i64} {
  func.func @_text_encoder_kernel(%arg0: i32, %arg1: i32, %arg2: memref<1x8x32xf32, #tpu.memory_space<vmem>>, %arg3: memref<1x1x32xf32, #tpu.memory_space<vmem>>, %arg4: memref<1x1x32xf32, #tpu.memory_space<vmem>>, %arg5: memref<1x32x96xbf16, #tpu.memory_space<vmem>>, %arg6: memref<1x1x96xf32, #tpu.memory_space<vmem>>, %arg7: memref<1x32x32xbf16, #tpu.memory_space<vmem>>, %arg8: memref<1x1x32xf32, #tpu.memory_space<vmem>>, %arg9: memref<1x1x32xf32, #tpu.memory_space<vmem>>, %arg10: memref<1x1x32xf32, #tpu.memory_space<vmem>>, %arg11: memref<1x32x128xbf16, #tpu.memory_space<vmem>>, %arg12: memref<1x1x128xf32, #tpu.memory_space<vmem>>, %arg13: memref<1x128x32xbf16, #tpu.memory_space<vmem>>, %arg14: memref<1x1x32xf32, #tpu.memory_space<vmem>>, %arg15: memref<1x32xf32, #tpu.memory_space<vmem>>, %arg16: memref<1x32xf32, #tpu.memory_space<vmem>>, %arg17: memref<1x8x1xf32, #tpu.memory_space<vmem>>, %arg18: memref<32x32xbf16, #tpu.memory_space<vmem>>, %arg19: memref<1x1x32xf32, #tpu.memory_space<vmem>>, %arg20: memref<8x32xf32, #tpu.memory_space<vmem>>) attributes {dimension_semantics = [#tpu.dimension_semantics<parallel>, #tpu.dimension_semantics<arbitrary>], iteration_bounds = array<i64: 2, 2>, scalar_prefetch = 0 : i64, scratch_operands = 1 : i64, tpu.core_type = #tpu.core_type<tc>, window_params = [{transform_indices = @transform_0, window_bounds = array<i64: 1, 8, 32>}, {transform_indices = @transform_1, window_bounds = array<i64: 1, 1, 32>}, {transform_indices = @transform_2, window_bounds = array<i64: 1, 1, 32>}, {transform_indices = @transform_3, window_bounds = array<i64: 1, 32, 96>}, {transform_indices = @transform_4, window_bounds = array<i64: 1, 1, 96>}, {transform_indices = @transform_5, window_bounds = array<i64: 1, 32, 32>}, {transform_indices = @transform_6, window_bounds = array<i64: 1, 1, 32>}, {transform_indices = @transform_7, window_bounds = array<i64: 1, 1, 32>}, {transform_indices = @transform_8, window_bounds = array<i64: 1, 1, 32>}, {transform_indices = @transform_9, window_bounds = array<i64: 1, 32, 128>}, {transform_indices = @transform_10, window_bounds = array<i64: 1, 1, 128>}, {transform_indices = @transform_11, window_bounds = array<i64: 1, 128, 32>}, {transform_indices = @transform_12, window_bounds = array<i64: 1, 1, 32>}, {pipeline_mode = #tpu.pipeline_mode<synchronous>, transform_indices = @transform_13, window_bounds = array<i64: 1, 32>}, {pipeline_mode = #tpu.pipeline_mode<synchronous>, transform_indices = @transform_14, window_bounds = array<i64: 1, 32>}, {transform_indices = @transform_15, window_bounds = array<i64: 1, 8, 1>}, {pipeline_mode = #tpu.pipeline_mode<synchronous>, transform_indices = @transform_16, window_bounds = array<i64: 32, 32>}, {transform_indices = @transform_17, window_bounds = array<i64: 1, 1, 32>}]} {
    %c0_i32 = arith.constant 0 : i32
    %0 = arith.cmpi eq, %arg1, %c0_i32 : i32
    %1 = arith.extui %0 : i1 to i32
    %c0_i32_0 = arith.constant 0 : i32
    %2 = arith.cmpi ne, %1, %c0_i32_0 : i32
    scf.if %2 {
      %c0_78 = arith.constant 0 : index
      %c0_79 = arith.constant 0 : index
      %c0_80 = arith.constant 0 : index
      %197 = vector.load %arg2[%c0_78, %c0_79, %c0_80] : memref<1x8x32xf32, #tpu.memory_space<vmem>>, vector<1x8x32xf32>
      %198 = vector.shape_cast %197 : vector<1x8x32xf32> to vector<8x32xf32>
      %c0_81 = arith.constant 0 : index
      %c0_82 = arith.constant 0 : index
      %199 = vector.load %arg20[%c0_81, %c0_82] : memref<8x32xf32, #tpu.memory_space<vmem>>, vector<8x32xf32>
      tpu.vector_store %arg20[%c0_81, %c0_82], %198 {strides = array<i32>} : memref<8x32xf32, #tpu.memory_space<vmem>>, vector<8x32xf32>,
    } else {
    }
    %c0 = arith.constant 0 : index
    %c0_1 = arith.constant 0 : index
    %3 = vector.load %arg20[%c0, %c0_1] : memref<8x32xf32, #tpu.memory_space<vmem>>, vector<8x32xf32>
    %c0_2 = arith.constant 0 : index
    %c0_3 = arith.constant 0 : index
    %c0_4 = arith.constant 0 : index
    %4 = vector.load %arg3[%c0_2, %c0_3, %c0_4] : memref<1x1x32xf32, #tpu.memory_space<vmem>>, vector<1x1x32xf32>
    %5 = vector.shape_cast %4 : vector<1x1x32xf32> to vector<1x32xf32>
    %c0_5 = arith.constant 0 : index
    %c0_6 = arith.constant 0 : index
    %c0_7 = arith.constant 0 : index
    %6 = vector.load %arg4[%c0_5, %c0_6, %c0_7] : memref<1x1x32xf32, #tpu.memory_space<vmem>>, vector<1x1x32xf32>
    %7 = vector.shape_cast %6 : vector<1x1x32xf32> to vector<1x32xf32>
    %cst = arith.constant dense<0.000000e+00> : vector<8xf32>
    %8 = vector.multi_reduction <add>, %3, %cst [1] : vector<8x32xf32> to vector<8xf32>
    %9 = vector.shape_cast %8 : vector<8xf32> to vector<8x1xf32>
    %cst_8 = arith.constant 3.200000e+01 : f32
    %10 = vector.broadcast %cst_8 : f32 to vector<8x1xf32>
    %11 = arith.divf %9, %10 : vector<8x1xf32>
    %12 = vector.broadcast %11 : vector<8x1xf32> to vector<8x32xf32>
    %13 = arith.subf %3, %12 : vector<8x32xf32>
    %14 = arith.mulf %13, %13 : vector<8x32xf32>
    %cst_9 = arith.constant dense<0.000000e+00> : vector<8xf32>
    %15 = vector.multi_reduction <add>, %14, %cst_9 [1] : vector<8x32xf32> to vector<8xf32>
    %16 = vector.shape_cast %15 : vector<8xf32> to vector<8x1xf32>
    %cst_10 = arith.constant 3.200000e+01 : f32
    %17 = vector.broadcast %cst_10 : f32 to vector<8x1xf32>
    %18 = arith.divf %16, %17 : vector<8x1xf32>
    %19 = vector.broadcast %11 : vector<8x1xf32> to vector<8x32xf32>
    %20 = arith.subf %3, %19 : vector<8x32xf32>
    %cst_11 = arith.constant 9.99999974E-6 : f32
    %21 = vector.broadcast %cst_11 : f32 to vector<8x1xf32>
    %22 = arith.addf %18, %21 : vector<8x1xf32>
    %23 = math.rsqrt %22 : vector<8x1xf32>
    %24 = vector.broadcast %23 : vector<8x1xf32> to vector<8x32xf32>
    %25 = arith.mulf %20, %24 : vector<8x32xf32>
    %26 = vector.broadcast %5 : vector<1x32xf32> to vector<8x32xf32>
    %27 = arith.mulf %25, %26 : vector<8x32xf32>
    %28 = vector.broadcast %7 : vector<1x32xf32> to vector<8x32xf32>
    %29 = arith.addf %27, %28 : vector<8x32xf32>
    %30 = arith.truncf %29 : vector<8x32xf32> to vector<8x32xbf16>
    %c0_12 = arith.constant 0 : index
    %c0_13 = arith.constant 0 : index
    %c0_14 = arith.constant 0 : index
    %31 = vector.load %arg5[%c0_12, %c0_13, %c0_14] : memref<1x32x96xbf16, #tpu.memory_space<vmem>>, vector<1x32x96xbf16>
    %32 = vector.shape_cast %31 : vector<1x32x96xbf16> to vector<32x96xbf16>
    %cst_15 = arith.constant dense<0.000000e+00> : vector<8x96xf32>
    %33 = tpu.matmul %30, %32, %cst_15 {dimension_numbers = #tpu.dot_dimension_numbers<[1], [0], [0], [1], [0, 0, 1, 1], [], []>} : vector<8x32xbf16>, vector<32x96xbf16>, vector<8x96xf32> -> vector<8x96xf32>
    %c0_16 = arith.constant 0 : index
    %c0_17 = arith.constant 0 : index
    %c0_18 = arith.constant 0 : index
    %34 = vector.load %arg6[%c0_16, %c0_17, %c0_18] : memref<1x1x96xf32, #tpu.memory_space<vmem>>, vector<1x1x96xf32>
    %35 = vector.shape_cast %34 : vector<1x1x96xf32> to vector<1x96xf32>
    %36 = vector.broadcast %35 : vector<1x96xf32> to vector<8x96xf32>
    %37 = arith.addf %33, %36 : vector<8x96xf32>
    %38 = tpu.iota {dimensions = array<i32: 0>} : vector<8x8xi32>
    %39 = tpu.iota {dimensions = array<i32: 1>} : vector<8x8xi32>
    %40 = arith.cmpi sgt, %39, %38 : vector<8x8xi32>
    %cst_19 = arith.constant -1.000000e+09 : f32
    %cst_20 = arith.constant 0.000000e+00 : f32
    %41 = vector.broadcast %cst_19 : f32 to vector<8x8xf32>
    %42 = vector.broadcast %cst_20 : f32 to vector<8x8xf32>
    %43 = arith.select %40, %41, %42 : vector<8x8xi1>, vector<8x8xf32>
    %44 = vector.extract_strided_slice %37 {offsets = [0, 0], sizes = [8, 8], strides = [1, 1]} : vector<8x96xf32> to vector<8x8xf32>
    %45 = arith.truncf %44 : vector<8x8xf32> to vector<8x8xbf16>
    %46 = vector.extract_strided_slice %37 {offsets = [0, 32], sizes = [8, 8], strides = [1, 1]} : vector<8x96xf32> to vector<8x8xf32>
    %47 = arith.truncf %46 : vector<8x8xf32> to vector<8x8xbf16>
    %48 = vector.extract_strided_slice %37 {offsets = [0, 64], sizes = [8, 8], strides = [1, 1]} : vector<8x96xf32> to vector<8x8xf32>
    %49 = arith.truncf %48 : vector<8x8xf32> to vector<8x8xbf16>
    %cst_21 = arith.constant dense<0.000000e+00> : vector<8x8xf32>
    %50 = tpu.matmul %45, %47, %cst_21 {dimension_numbers = #tpu.dot_dimension_numbers<[1], [1], [0], [0], [0, 0, 1, 0], [], []>} : vector<8x8xbf16>, vector<8x8xbf16>, vector<8x8xf32> -> vector<8x8xf32>
    %cst_22 = arith.constant 0.353553385 : f32
    %51 = vector.broadcast %cst_22 : f32 to vector<8x8xf32>
    %52 = arith.mulf %50, %51 : vector<8x8xf32>
    %53 = arith.addf %52, %43 : vector<8x8xf32>
    %cst_23 = arith.constant dense<0xFF800000> : vector<8xf32>
    %54 = vector.multi_reduction <maximumf>, %53, %cst_23 [1] : vector<8x8xf32> to vector<8xf32>
    %55 = vector.shape_cast %54 : vector<8xf32> to vector<8x1xf32>
    %56 = vector.broadcast %55 : vector<8x1xf32> to vector<8x8xf32>
    %57 = arith.subf %53, %56 : vector<8x8xf32>
    %58 = math.exp %57 : vector<8x8xf32>
    %cst_24 = arith.constant dense<0.000000e+00> : vector<8xf32>
    %59 = vector.multi_reduction <add>, %58, %cst_24 [1] : vector<8x8xf32> to vector<8xf32>
    %60 = vector.shape_cast %59 : vector<8xf32> to vector<8x1xf32>
    %61 = tpu.reciprocal %60 {approx = true} : vector<8x1xf32> -> vector<8x1xf32>
    %62 = vector.broadcast %61 : vector<8x1xf32> to vector<8x8xf32>
    %63 = arith.mulf %58, %62 : vector<8x8xf32>
    %64 = arith.truncf %63 : vector<8x8xf32> to vector<8x8xbf16>
    %cst_25 = arith.constant dense<0.000000e+00> : vector<8x8xf32>
    %65 = tpu.matmul %64, %49, %cst_25 {dimension_numbers = #tpu.dot_dimension_numbers<[1], [0], [0], [1], [0, 0, 1, 1], [], []>} : vector<8x8xbf16>, vector<8x8xbf16>, vector<8x8xf32> -> vector<8x8xf32>
    %66 = vector.extract_strided_slice %37 {offsets = [0, 8], sizes = [8, 8], strides = [1, 1]} : vector<8x96xf32> to vector<8x8xf32>
    %67 = arith.truncf %66 : vector<8x8xf32> to vector<8x8xbf16>
    %68 = vector.extract_strided_slice %37 {offsets = [0, 40], sizes = [8, 8], strides = [1, 1]} : vector<8x96xf32> to vector<8x8xf32>
    %69 = arith.truncf %68 : vector<8x8xf32> to vector<8x8xbf16>
    %70 = vector.extract_strided_slice %37 {offsets = [0, 72], sizes = [8, 8], strides = [1, 1]} : vector<8x96xf32> to vector<8x8xf32>
    %71 = arith.truncf %70 : vector<8x8xf32> to vector<8x8xbf16>
    %cst_26 = arith.constant dense<0.000000e+00> : vector<8x8xf32>
    %72 = tpu.matmul %67, %69, %cst_26 {dimension_numbers = #tpu.dot_dimension_numbers<[1], [1], [0], [0], [0, 0, 1, 0], [], []>} : vector<8x8xbf16>, vector<8x8xbf16>, vector<8x8xf32> -> vector<8x8xf32>
    %cst_27 = arith.constant 0.353553385 : f32
    %73 = vector.broadcast %cst_27 : f32 to vector<8x8xf32>
    %74 = arith.mulf %72, %73 : vector<8x8xf32>
    %75 = arith.addf %74, %43 : vector<8x8xf32>
    %cst_28 = arith.constant dense<0xFF800000> : vector<8xf32>
    %76 = vector.multi_reduction <maximumf>, %75, %cst_28 [1] : vector<8x8xf32> to vector<8xf32>
    %77 = vector.shape_cast %76 : vector<8xf32> to vector<8x1xf32>
    %78 = vector.broadcast %77 : vector<8x1xf32> to vector<8x8xf32>
    %79 = arith.subf %75, %78 : vector<8x8xf32>
    %80 = math.exp %79 : vector<8x8xf32>
    %cst_29 = arith.constant dense<0.000000e+00> : vector<8xf32>
    %81 = vector.multi_reduction <add>, %80, %cst_29 [1] : vector<8x8xf32> to vector<8xf32>
    %82 = vector.shape_cast %81 : vector<8xf32> to vector<8x1xf32>
    %83 = tpu.reciprocal %82 {approx = true} : vector<8x1xf32> -> vector<8x1xf32>
    %84 = vector.broadcast %83 : vector<8x1xf32> to vector<8x8xf32>
    %85 = arith.mulf %80, %84 : vector<8x8xf32>
    %86 = arith.truncf %85 : vector<8x8xf32> to vector<8x8xbf16>
    %cst_30 = arith.constant dense<0.000000e+00> : vector<8x8xf32>
    %87 = tpu.matmul %86, %71, %cst_30 {dimension_numbers = #tpu.dot_dimension_numbers<[1], [0], [0], [1], [0, 0, 1, 1], [], []>} : vector<8x8xbf16>, vector<8x8xbf16>, vector<8x8xf32> -> vector<8x8xf32>
    %88 = vector.extract_strided_slice %37 {offsets = [0, 16], sizes = [8, 8], strides = [1, 1]} : vector<8x96xf32> to vector<8x8xf32>
    %89 = arith.truncf %88 : vector<8x8xf32> to vector<8x8xbf16>
    %90 = vector.extract_strided_slice %37 {offsets = [0, 48], sizes = [8, 8], strides = [1, 1]} : vector<8x96xf32> to vector<8x8xf32>
    %91 = arith.truncf %90 : vector<8x8xf32> to vector<8x8xbf16>
    %92 = vector.extract_strided_slice %37 {offsets = [0, 80], sizes = [8, 8], strides = [1, 1]} : vector<8x96xf32> to vector<8x8xf32>
    %93 = arith.truncf %92 : vector<8x8xf32> to vector<8x8xbf16>
    %cst_31 = arith.constant dense<0.000000e+00> : vector<8x8xf32>
    %94 = tpu.matmul %89, %91, %cst_31 {dimension_numbers = #tpu.dot_dimension_numbers<[1], [1], [0], [0], [0, 0, 1, 0], [], []>} : vector<8x8xbf16>, vector<8x8xbf16>, vector<8x8xf32> -> vector<8x8xf32>
    %cst_32 = arith.constant 0.353553385 : f32
    %95 = vector.broadcast %cst_32 : f32 to vector<8x8xf32>
    %96 = arith.mulf %94, %95 : vector<8x8xf32>
    %97 = arith.addf %96, %43 : vector<8x8xf32>
    %cst_33 = arith.constant dense<0xFF800000> : vector<8xf32>
    %98 = vector.multi_reduction <maximumf>, %97, %cst_33 [1] : vector<8x8xf32> to vector<8xf32>
    %99 = vector.shape_cast %98 : vector<8xf32> to vector<8x1xf32>
    %100 = vector.broadcast %99 : vector<8x1xf32> to vector<8x8xf32>
    %101 = arith.subf %97, %100 : vector<8x8xf32>
    %102 = math.exp %101 : vector<8x8xf32>
    %cst_34 = arith.constant dense<0.000000e+00> : vector<8xf32>
    %103 = vector.multi_reduction <add>, %102, %cst_34 [1] : vector<8x8xf32> to vector<8xf32>
    %104 = vector.shape_cast %103 : vector<8xf32> to vector<8x1xf32>
    %105 = tpu.reciprocal %104 {approx = true} : vector<8x1xf32> -> vector<8x1xf32>
    %106 = vector.broadcast %105 : vector<8x1xf32> to vector<8x8xf32>
    %107 = arith.mulf %102, %106 : vector<8x8xf32>
    %108 = arith.truncf %107 : vector<8x8xf32> to vector<8x8xbf16>
    %cst_35 = arith.constant dense<0.000000e+00> : vector<8x8xf32>
    %109 = tpu.matmul %108, %93, %cst_35 {dimension_numbers = #tpu.dot_dimension_numbers<[1], [0], [0], [1], [0, 0, 1, 1], [], []>} : vector<8x8xbf16>, vector<8x8xbf16>, vector<8x8xf32> -> vector<8x8xf32>
    %110 = vector.extract_strided_slice %37 {offsets = [0, 24], sizes = [8, 8], strides = [1, 1]} : vector<8x96xf32> to vector<8x8xf32>
    %111 = arith.truncf %110 : vector<8x8xf32> to vector<8x8xbf16>
    %112 = vector.extract_strided_slice %37 {offsets = [0, 56], sizes = [8, 8], strides = [1, 1]} : vector<8x96xf32> to vector<8x8xf32>
    %113 = arith.truncf %112 : vector<8x8xf32> to vector<8x8xbf16>
    %114 = vector.extract_strided_slice %37 {offsets = [0, 88], sizes = [8, 8], strides = [1, 1]} : vector<8x96xf32> to vector<8x8xf32>
    %115 = arith.truncf %114 : vector<8x8xf32> to vector<8x8xbf16>
    %cst_36 = arith.constant dense<0.000000e+00> : vector<8x8xf32>
    %116 = tpu.matmul %111, %113, %cst_36 {dimension_numbers = #tpu.dot_dimension_numbers<[1], [1], [0], [0], [0, 0, 1, 0], [], []>} : vector<8x8xbf16>, vector<8x8xbf16>, vector<8x8xf32> -> vector<8x8xf32>
    %cst_37 = arith.constant 0.353553385 : f32
    %117 = vector.broadcast %cst_37 : f32 to vector<8x8xf32>
    %118 = arith.mulf %116, %117 : vector<8x8xf32>
    %119 = arith.addf %118, %43 : vector<8x8xf32>
    %cst_38 = arith.constant dense<0xFF800000> : vector<8xf32>
    %120 = vector.multi_reduction <maximumf>, %119, %cst_38 [1] : vector<8x8xf32> to vector<8xf32>
    %121 = vector.shape_cast %120 : vector<8xf32> to vector<8x1xf32>
    %122 = vector.broadcast %121 : vector<8x1xf32> to vector<8x8xf32>
    %123 = arith.subf %119, %122 : vector<8x8xf32>
    %124 = math.exp %123 : vector<8x8xf32>
    %cst_39 = arith.constant dense<0.000000e+00> : vector<8xf32>
    %125 = vector.multi_reduction <add>, %124, %cst_39 [1] : vector<8x8xf32> to vector<8xf32>
    %126 = vector.shape_cast %125 : vector<8xf32> to vector<8x1xf32>
    %127 = tpu.reciprocal %126 {approx = true} : vector<8x1xf32> -> vector<8x1xf32>
    %128 = vector.broadcast %127 : vector<8x1xf32> to vector<8x8xf32>
    %129 = arith.mulf %124, %128 : vector<8x8xf32>
    %130 = arith.truncf %129 : vector<8x8xf32> to vector<8x8xbf16>
    %cst_40 = arith.constant dense<0.000000e+00> : vector<8x8xf32>
    %131 = tpu.matmul %130, %115, %cst_40 {dimension_numbers = #tpu.dot_dimension_numbers<[1], [0], [0], [1], [0, 0, 1, 1], [], []>} : vector<8x8xbf16>, vector<8x8xbf16>, vector<8x8xf32> -> vector<8x8xf32>
    %132 = tpu.concatenate %65, %87, %109, %131 in 1 : vector<8x8xf32>, vector<8x8xf32>, vector<8x8xf32>, vector<8x8xf32> -> vector<8x32xf32>
    %133 = arith.truncf %132 : vector<8x32xf32> to vector<8x32xbf16>
    %c0_41 = arith.constant 0 : index
    %c0_42 = arith.constant 0 : index
    %c0_43 = arith.constant 0 : index
    %134 = vector.load %arg7[%c0_41, %c0_42, %c0_43] : memref<1x32x32xbf16, #tpu.memory_space<vmem>>, vector<1x32x32xbf16>
    %135 = vector.shape_cast %134 : vector<1x32x32xbf16> to vector<32x32xbf16>
    %cst_44 = arith.constant dense<0.000000e+00> : vector<8x32xf32>
    %136 = tpu.matmul %133, %135, %cst_44 {dimension_numbers = #tpu.dot_dimension_numbers<[1], [0], [0], [1], [0, 0, 1, 1], [], []>} : vector<8x32xbf16>, vector<32x32xbf16>, vector<8x32xf32> -> vector<8x32xf32>
    %137 = arith.addf %3, %136 : vector<8x32xf32>
    %c0_45 = arith.constant 0 : index
    %c0_46 = arith.constant 0 : index
    %c0_47 = arith.constant 0 : index
    %138 = vector.load %arg8[%c0_45, %c0_46, %c0_47] : memref<1x1x32xf32, #tpu.memory_space<vmem>>, vector<1x1x32xf32>
    %139 = vector.shape_cast %138 : vector<1x1x32xf32> to vector<1x32xf32>
    %140 = vector.broadcast %139 : vector<1x32xf32> to vector<8x32xf32>
    %141 = arith.addf %137, %140 : vector<8x32xf32>
    %c0_48 = arith.constant 0 : index
    %c0_49 = arith.constant 0 : index
    %c0_50 = arith.constant 0 : index
    %142 = vector.load %arg9[%c0_48, %c0_49, %c0_50] : memref<1x1x32xf32, #tpu.memory_space<vmem>>, vector<1x1x32xf32>
    %143 = vector.shape_cast %142 : vector<1x1x32xf32> to vector<1x32xf32>
    %c0_51 = arith.constant 0 : index
    %c0_52 = arith.constant 0 : index
    %c0_53 = arith.constant 0 : index
    %144 = vector.load %arg10[%c0_51, %c0_52, %c0_53] : memref<1x1x32xf32, #tpu.memory_space<vmem>>, vector<1x1x32xf32>
    %145 = vector.shape_cast %144 : vector<1x1x32xf32> to vector<1x32xf32>
    %cst_54 = arith.constant dense<0.000000e+00> : vector<8xf32>
    %146 = vector.multi_reduction <add>, %141, %cst_54 [1] : vector<8x32xf32> to vector<8xf32>
    %147 = vector.shape_cast %146 : vector<8xf32> to vector<8x1xf32>
    %cst_55 = arith.constant 3.200000e+01 : f32
    %148 = vector.broadcast %cst_55 : f32 to vector<8x1xf32>
    %149 = arith.divf %147, %148 : vector<8x1xf32>
    %150 = vector.broadcast %149 : vector<8x1xf32> to vector<8x32xf32>
    %151 = arith.subf %141, %150 : vector<8x32xf32>
    %152 = arith.mulf %151, %151 : vector<8x32xf32>
    %cst_56 = arith.constant dense<0.000000e+00> : vector<8xf32>
    %153 = vector.multi_reduction <add>, %152, %cst_56 [1] : vector<8x32xf32> to vector<8xf32>
    %154 = vector.shape_cast %153 : vector<8xf32> to vector<8x1xf32>
    %cst_57 = arith.constant 3.200000e+01 : f32
    %155 = vector.broadcast %cst_57 : f32 to vector<8x1xf32>
    %156 = arith.divf %154, %155 : vector<8x1xf32>
    %157 = vector.broadcast %149 : vector<8x1xf32> to vector<8x32xf32>
    %158 = arith.subf %141, %157 : vector<8x32xf32>
    %cst_58 = arith.constant 9.99999974E-6 : f32
    %159 = vector.broadcast %cst_58 : f32 to vector<8x1xf32>
    %160 = arith.addf %156, %159 : vector<8x1xf32>
    %161 = math.rsqrt %160 : vector<8x1xf32>
    %162 = vector.broadcast %161 : vector<8x1xf32> to vector<8x32xf32>
    %163 = arith.mulf %158, %162 : vector<8x32xf32>
    %164 = vector.broadcast %143 : vector<1x32xf32> to vector<8x32xf32>
    %165 = arith.mulf %163, %164 : vector<8x32xf32>
    %166 = vector.broadcast %145 : vector<1x32xf32> to vector<8x32xf32>
    %167 = arith.addf %165, %166 : vector<8x32xf32>
    %168 = arith.truncf %167 : vector<8x32xf32> to vector<8x32xbf16>
    %c0_59 = arith.constant 0 : index
    %c0_60 = arith.constant 0 : index
    %c0_61 = arith.constant 0 : index
    %169 = vector.load %arg11[%c0_59, %c0_60, %c0_61] : memref<1x32x128xbf16, #tpu.memory_space<vmem>>, vector<1x32x128xbf16>
    %170 = vector.shape_cast %169 : vector<1x32x128xbf16> to vector<32x128xbf16>
    %cst_62 = arith.constant dense<0.000000e+00> : vector<8x128xf32>
    %171 = tpu.matmul %168, %170, %cst_62 {dimension_numbers = #tpu.dot_dimension_numbers<[1], [0], [0], [1], [0, 0, 1, 1], [], []>} : vector<8x32xbf16>, vector<32x128xbf16>, vector<8x128xf32> -> vector<8x128xf32>
    %c0_63 = arith.constant 0 : index
    %c0_64 = arith.constant 0 : index
    %c0_65 = arith.constant 0 : index
    %172 = vector.load %arg12[%c0_63, %c0_64, %c0_65] : memref<1x1x128xf32, #tpu.memory_space<vmem>>, vector<1x1x128xf32>
    %173 = vector.shape_cast %172 : vector<1x1x128xf32> to vector<1x128xf32>
    %174 = vector.broadcast %173 : vector<1x128xf32> to vector<8x128xf32>
    %175 = arith.addf %171, %174 : vector<8x128xf32>
    %cst_66 = arith.constant 1.702000e+00 : f32
    %176 = vector.broadcast %cst_66 : f32 to vector<8x128xf32>
    %177 = arith.mulf %176, %175 : vector<8x128xf32>
    %178 = arith.negf %177 : vector<8x128xf32>
    %179 = math.exp %178 : vector<8x128xf32>
    %cst_67 = arith.constant 1.000000e+00 : f32
    %180 = vector.broadcast %cst_67 : f32 to vector<8x128xf32>
    %181 = arith.addf %180, %179 : vector<8x128xf32>
    %182 = arith.divf %180, %181 : vector<8x128xf32>
    %183 = arith.mulf %175, %182 : vector<8x128xf32>
    %184 = arith.truncf %183 : vector<8x128xf32> to vector<8x128xbf16>
    %c0_68 = arith.constant 0 : index
    %c0_69 = arith.constant 0 : index
    %c0_70 = arith.constant 0 : index
    %185 = vector.load %arg13[%c0_68, %c0_69, %c0_70] : memref<1x128x32xbf16, #tpu.memory_space<vmem>>, vector<1x128x32xbf16>
    %186 = vector.shape_cast %185 : vector<1x128x32xbf16> to vector<128x32xbf16>
    %cst_71 = arith.constant dense<0.000000e+00> : vector<8x32xf32>
    %187 = tpu.matmul %184, %186, %cst_71 {dimension_numbers = #tpu.dot_dimension_numbers<[1], [0], [0], [1], [0, 0, 1, 1], [], []>} : vector<8x128xbf16>, vector<128x32xbf16>, vector<8x32xf32> -> vector<8x32xf32>
    %188 = arith.addf %141, %187 : vector<8x32xf32>
    %c0_72 = arith.constant 0 : index
    %c0_73 = arith.constant 0 : index
    %c0_74 = arith.constant 0 : index
    %189 = vector.load %arg14[%c0_72, %c0_73, %c0_74] : memref<1x1x32xf32, #tpu.memory_space<vmem>>, vector<1x1x32xf32>
    %190 = vector.shape_cast %189 : vector<1x1x32xf32> to vector<1x32xf32>
    %191 = vector.broadcast %190 : vector<1x32xf32> to vector<8x32xf32>
    %192 = arith.addf %188, %191 : vector<8x32xf32>
    %c0_75 = arith.constant 0 : index
    %c0_76 = arith.constant 0 : index
    %193 = vector.load %arg20[%c0_75, %c0_76] : memref<8x32xf32, #tpu.memory_space<vmem>>, vector<8x32xf32>
    tpu.vector_store %arg20[%c0_75, %c0_76], %192 {strides = array<i32>} : memref<8x32xf32, #tpu.memory_space<vmem>>, vector<8x32xf32>,
    %c1_i32 = arith.constant 1 : i32
    %194 = arith.cmpi eq, %arg1, %c1_i32 : i32
    %195 = arith.extui %194 : i1 to i32
    %c0_i32_77 = arith.constant 0 : i32
    %196 = arith.cmpi ne, %195, %c0_i32_77 : i32
    scf.if %196 {
      %c0_78 = arith.constant 0 : index
      %c0_79 = arith.constant 0 : index
      %197 = vector.load %arg15[%c0_78, %c0_79] : memref<1x32xf32, #tpu.memory_space<vmem>>, vector<1x32xf32>
      %c0_80 = arith.constant 0 : index
      %c0_81 = arith.constant 0 : index
      %198 = vector.load %arg16[%c0_80, %c0_81] : memref<1x32xf32, #tpu.memory_space<vmem>>, vector<1x32xf32>
      %cst_82 = arith.constant dense<0.000000e+00> : vector<8xf32>
      %199 = vector.multi_reduction <add>, %192, %cst_82 [1] : vector<8x32xf32> to vector<8xf32>
      %200 = vector.shape_cast %199 : vector<8xf32> to vector<8x1xf32>
      %cst_83 = arith.constant 3.200000e+01 : f32
      %201 = vector.broadcast %cst_83 : f32 to vector<8x1xf32>
      %202 = arith.divf %200, %201 : vector<8x1xf32>
      %203 = vector.broadcast %202 : vector<8x1xf32> to vector<8x32xf32>
      %204 = arith.subf %192, %203 : vector<8x32xf32>
      %205 = arith.mulf %204, %204 : vector<8x32xf32>
      %cst_84 = arith.constant dense<0.000000e+00> : vector<8xf32>
      %206 = vector.multi_reduction <add>, %205, %cst_84 [1] : vector<8x32xf32> to vector<8xf32>
      %207 = vector.shape_cast %206 : vector<8xf32> to vector<8x1xf32>
      %cst_85 = arith.constant 3.200000e+01 : f32
      %208 = vector.broadcast %cst_85 : f32 to vector<8x1xf32>
      %209 = arith.divf %207, %208 : vector<8x1xf32>
      %210 = vector.broadcast %202 : vector<8x1xf32> to vector<8x32xf32>
      %211 = arith.subf %192, %210 : vector<8x32xf32>
      %cst_86 = arith.constant 9.99999974E-6 : f32
      %212 = vector.broadcast %cst_86 : f32 to vector<8x1xf32>
      %213 = arith.addf %209, %212 : vector<8x1xf32>
      %214 = math.rsqrt %213 : vector<8x1xf32>
      %215 = vector.broadcast %214 : vector<8x1xf32> to vector<8x32xf32>
      %216 = arith.mulf %211, %215 : vector<8x32xf32>
      %217 = vector.broadcast %197 : vector<1x32xf32> to vector<8x32xf32>
      %218 = arith.mulf %216, %217 : vector<8x32xf32>
      %219 = vector.broadcast %198 : vector<1x32xf32> to vector<8x32xf32>
      %220 = arith.addf %218, %219 : vector<8x32xf32>
      %c0_87 = arith.constant 0 : index
      %c0_88 = arith.constant 0 : index
      %c0_89 = arith.constant 0 : index
      %221 = vector.load %arg17[%c0_87, %c0_88, %c0_89] : memref<1x8x1xf32, #tpu.memory_space<vmem>>, vector<1x8x1xf32>
      %222 = vector.shape_cast %221 : vector<1x8x1xf32> to vector<8x1xf32>
      %223 = vector.broadcast %222 : vector<8x1xf32> to vector<8x32xf32>
      %224 = arith.mulf %220, %223 : vector<8x32xf32>
      %cst_90 = arith.constant dense<0.000000e+00> : vector<32xf32>
      %225 = vector.multi_reduction <add>, %224, %cst_90 [0] : vector<8x32xf32> to vector<32xf32>
      %226 = vector.shape_cast %225 : vector<32xf32> to vector<1x32xf32>
      %227 = arith.truncf %226 : vector<1x32xf32> to vector<1x32xbf16>
      %c0_91 = arith.constant 0 : index
      %c0_92 = arith.constant 0 : index
      %228 = vector.load %arg18[%c0_91, %c0_92] : memref<32x32xbf16, #tpu.memory_space<vmem>>, vector<32x32xbf16>
      %cst_93 = arith.constant dense<0.000000e+00> : vector<1x32xf32>
      %229 = tpu.matmul %227, %228, %cst_93 {dimension_numbers = #tpu.dot_dimension_numbers<[1], [0], [0], [1], [0, 0, 1, 1], [], []>} : vector<1x32xbf16>, vector<32x32xbf16>, vector<1x32xf32> -> vector<1x32xf32>
      %c0_94 = arith.constant 0 : index
      %c0_95 = arith.constant 0 : index
      %c0_96 = arith.constant 0 : index
      %230 = vector.load %arg19[%c0_94, %c0_95, %c0_96] : memref<1x1x32xf32, #tpu.memory_space<vmem>>, vector<1x1x32xf32>
      %231 = vector.shape_cast %230 : vector<1x1x32xf32> to vector<1x32xf32>
      %232 = vector.shape_cast %229 : vector<1x32xf32> to vector<1x1x32xf32>
      tpu.vector_store %arg19[%c0_94, %c0_95, %c0_96], %232 {strides = array<i32>} : memref<1x1x32xf32, #tpu.memory_space<vmem>>, vector<1x1x32xf32>,
    } else {
    }
    return
  }
  func.func @transform_0(%arg0: i32, %arg1: i32) -> (i32, i32, i32) {
    %c0_i32 = arith.constant 0 : i32
    %c0_i32_0 = arith.constant 0 : i32
    %c0_i32_1 = arith.constant 0 : i32
    return %arg0, %c0_i32, %c0_i32_0 : i32, i32, i32
  }
  func.func @transform_1(%arg0: i32, %arg1: i32) -> (i32, i32, i32) {
    %c0_i32 = arith.constant 0 : i32
    %c0_i32_0 = arith.constant 0 : i32
    %c0_i32_1 = arith.constant 0 : i32
    return %arg1, %c0_i32, %c0_i32_0 : i32, i32, i32
  }
  func.func @transform_2(%arg0: i32, %arg1: i32) -> (i32, i32, i32) {
    %c0_i32 = arith.constant 0 : i32
    %c0_i32_0 = arith.constant 0 : i32
    %c0_i32_1 = arith.constant 0 : i32
    return %arg1, %c0_i32, %c0_i32_0 : i32, i32, i32
  }
  func.func @transform_3(%arg0: i32, %arg1: i32) -> (i32, i32, i32) {
    %c0_i32 = arith.constant 0 : i32
    %c0_i32_0 = arith.constant 0 : i32
    %c0_i32_1 = arith.constant 0 : i32
    return %arg1, %c0_i32, %c0_i32_0 : i32, i32, i32
  }
  func.func @transform_4(%arg0: i32, %arg1: i32) -> (i32, i32, i32) {
    %c0_i32 = arith.constant 0 : i32
    %c0_i32_0 = arith.constant 0 : i32
    %c0_i32_1 = arith.constant 0 : i32
    return %arg1, %c0_i32, %c0_i32_0 : i32, i32, i32
  }
  func.func @transform_5(%arg0: i32, %arg1: i32) -> (i32, i32, i32) {
    %c0_i32 = arith.constant 0 : i32
    %c0_i32_0 = arith.constant 0 : i32
    %c0_i32_1 = arith.constant 0 : i32
    return %arg1, %c0_i32, %c0_i32_0 : i32, i32, i32
  }
  func.func @transform_6(%arg0: i32, %arg1: i32) -> (i32, i32, i32) {
    %c0_i32 = arith.constant 0 : i32
    %c0_i32_0 = arith.constant 0 : i32
    %c0_i32_1 = arith.constant 0 : i32
    return %arg1, %c0_i32, %c0_i32_0 : i32, i32, i32
  }
  func.func @transform_7(%arg0: i32, %arg1: i32) -> (i32, i32, i32) {
    %c0_i32 = arith.constant 0 : i32
    %c0_i32_0 = arith.constant 0 : i32
    %c0_i32_1 = arith.constant 0 : i32
    return %arg1, %c0_i32, %c0_i32_0 : i32, i32, i32
  }
  func.func @transform_8(%arg0: i32, %arg1: i32) -> (i32, i32, i32) {
    %c0_i32 = arith.constant 0 : i32
    %c0_i32_0 = arith.constant 0 : i32
    %c0_i32_1 = arith.constant 0 : i32
    return %arg1, %c0_i32, %c0_i32_0 : i32, i32, i32
  }
  func.func @transform_9(%arg0: i32, %arg1: i32) -> (i32, i32, i32) {
    %c0_i32 = arith.constant 0 : i32
    %c0_i32_0 = arith.constant 0 : i32
    %c0_i32_1 = arith.constant 0 : i32
    return %arg1, %c0_i32, %c0_i32_0 : i32, i32, i32
  }
  func.func @transform_10(%arg0: i32, %arg1: i32) -> (i32, i32, i32) {
    %c0_i32 = arith.constant 0 : i32
    %c0_i32_0 = arith.constant 0 : i32
    %c0_i32_1 = arith.constant 0 : i32
    return %arg1, %c0_i32, %c0_i32_0 : i32, i32, i32
  }
  func.func @transform_11(%arg0: i32, %arg1: i32) -> (i32, i32, i32) {
    %c0_i32 = arith.constant 0 : i32
    %c0_i32_0 = arith.constant 0 : i32
    %c0_i32_1 = arith.constant 0 : i32
    return %arg1, %c0_i32, %c0_i32_0 : i32, i32, i32
  }
  func.func @transform_12(%arg0: i32, %arg1: i32) -> (i32, i32, i32) {
    %c0_i32 = arith.constant 0 : i32
    %c0_i32_0 = arith.constant 0 : i32
    %c0_i32_1 = arith.constant 0 : i32
    return %arg1, %c0_i32, %c0_i32_0 : i32, i32, i32
  }
  func.func @transform_13(%arg0: i32, %arg1: i32) -> (i32, i32) {
    %c0_i32 = arith.constant 0 : i32
    %c0_i32_0 = arith.constant 0 : i32
    %c0_i32_1 = arith.constant 0 : i32
    return %c0_i32, %c0_i32_0 : i32, i32
  }
  func.func @transform_14(%arg0: i32, %arg1: i32) -> (i32, i32) {
    %c0_i32 = arith.constant 0 : i32
    %c0_i32_0 = arith.constant 0 : i32
    %c0_i32_1 = arith.constant 0 : i32
    return %c0_i32, %c0_i32_0 : i32, i32
  }
  func.func @transform_15(%arg0: i32, %arg1: i32) -> (i32, i32, i32) {
    %c0_i32 = arith.constant 0 : i32
    %c0_i32_0 = arith.constant 0 : i32
    %c0_i32_1 = arith.constant 0 : i32
    return %arg0, %c0_i32, %c0_i32_0 : i32, i32, i32
  }
  func.func @transform_16(%arg0: i32, %arg1: i32) -> (i32, i32) {
    %c0_i32 = arith.constant 0 : i32
    %c0_i32_0 = arith.constant 0 : i32
    %c0_i32_1 = arith.constant 0 : i32
    return %c0_i32, %c0_i32_0 : i32, i32
  }
  func.func @transform_17(%arg0: i32, %arg1: i32) -> (i32, i32, i32) {
    %c0_i32 = arith.constant 0 : i32
    %c0_i32_0 = arith.constant 0 : i32
    %c0_i32_1 = arith.constant 0 : i32
    return %arg0, %c0_i32, %c0_i32_0 : i32, i32, i32
  }
}

</mosaic_0001>

<bundles_post_ra>
// kernel: tpu_custom_call.1
= control target key start
LH: loop header
LB: loop body
LE: loop exit
PB: predicated region body
PF: predicated region fallthrough
CT: control target
= control target key end

     0   :  { %s2857_s0 = inlined_call_operand.vmem [shape: f32[2,8,32], index: 0, kind: input, shape index: {}]   ;;  %s2858_s1 = inlined_call_operand.vmem [shape: f32[2,1,32], index: 1, kind: input, shape index: {}]   ;;  %s2859_s2 = inlined_call_operand.vmem [shape: f32[2,1,32], index: 2, kind: input, shape index: {}]   ;;  %s2860_s3 = inlined_call_operand.vmem [shape: bf16[2,32,96], index: 3, kind: input, shape index: {}]   ;;  %s2861_s4 = inlined_call_operand.vmem [shape: f32[2,1,96], index: 4, kind: input, shape index: {}]   ;;  %s2862_s5 = inlined_call_operand.vmem [shape: bf16[2,32,32], index: 5, kind: input, shape index: {}]   ;;  %s2863_s6 = inlined_call_operand.vmem [shape: f32[2,1,32], index: 6, kind: input, shape index: {}]   ;;  %s2864_s7 = inlined_call_operand.vmem [shape: f32[2,1,32], index: 7, kind: input, shape index: {}]   ;;  %s2865_s8 = inlined_call_operand.vmem [shape: f32[2,1,32], index: 8, kind: input, shape index: {}]   ;;  %s2866_s9 = inlined_call_operand.vmem [shape: bf16[2,32,128], index: 9, kind: input, shape index: {}]   ;;  %s2867_s10 = inlined_call_operand.vmem [shape: f32[2,1,128], index: 10, kind: input, shape index: {}]   ;;  %s2868_s11 = inlined_call_operand.vmem [shape: bf16[2,128,32], index: 11, kind: input, shape index: {}]   ;;  %s2869_s12 = inlined_call_operand.vmem [shape: f32[2,1,32], index: 12, kind: input, shape index: {}]   ;;  %s2870_s13 = inlined_call_operand.vmem [shape: f32[1,32], index: 13, kind: input, shape index: {}]   ;;  %s2871_s14 = inlined_call_operand.vmem [shape: f32[1,32], index: 14, kind: input, shape index: {}]   ;;  %s2872_s15 = inlined_call_operand.vmem [shape: f32[2,8,1], index: 15, kind: input, shape index: {}]   ;;  %s2873_s16 = inlined_call_operand.vmem [shape: bf16[32,32], index: 16, kind: input, shape index: {}]   ;;  %s2874_s17 = inlined_call_operand.hbm [shape: f32[2,1,32], index: 17, kind: output, shape index: {}]  }
   0x1   :  { %2889 = sst [smem:[#allocation18_spill]] %s2857_s0 }
   0x2   :  { %2890 = sst [smem:[#allocation19_spill]] %s2858_s1 }
   0x3   :  { %2891 = sst [smem:[#allocation20_spill]] %s2859_s2 }
   0x4   :  { %2892 = sst [smem:[#allocation21_spill]] %s2860_s3 }
   0x5   :  { %2893 = sst [smem:[#allocation22_spill]] %s2862_s5 }
   0x6   :  { %2894 = sst [smem:[#allocation23_spill]] %s2870_s13 }
   0x7   :  { %2895 = sst [smem:[#allocation24_spill]] %s2871_s14 }
   0x8   :  { %2896 = sst [smem:[#allocation25_spill]] %s2872_s15 }
   0x9   :  { %2897 = sst [smem:[#allocation26_spill]] %s2873_s16 }
   0xa   :  { %2898 = sst [smem:[#allocation27_spill]] %s2874_s17 }
   0xb   :  { %22 = vsyncpa [#allocation4], 0 }
   0xc   :  { %24 = vsyncpa [#allocation4 + $0x1], 0  ;;  %s2490_s24 = smov 0   ;;  %s2492_s25 = smov 0  }
   0xd   :  { %s2494_s26 = smov 0   ;;  %s2496_s27 = smov 0  }
   0xe   :  { %s2498_s28 = smov 0   ;;  %s2500_s29 = smov 0  }
   0xf   :  { %s2502_s0 = smov 0   ;;  %s2504_s30 = smov 0  }
  0x10 LB: > { %2899 = sst [smem:[#allocation6_spill]] %s2350_s24  ;;  %s1952_s18 = sadd.s32 4294967295, %s2378_s30   ;;  %s2378_s30 = sphi %s2504_s30, %s30_s30   ;;  %s2374_s0 = sphi %s2502_s0, %s2945_s0   ;;  %s2370_s29 = sphi %s2500_s29, %s2944_s29   ;;  %s2366_s28 = sphi %s2498_s28, %s2943_s28   ;;  %s2362_s27 = sphi %s2496_s27, %s2942_s27   ;;  %s2358_s26 = sphi %s2494_s26, %s2941_s26   ;;  %s2354_s25 = sphi %s2492_s25, %s2947_s25   ;;  %s2350_s24 = sphi %s2490_s24, %s2946_s24  }
  0x11   : > { %2900 = sst [smem:[#allocation7_spill]] %s2358_s26  ;;  %s1953_s19 = sadd.s32 4294967294, %s2378_s30  }
  0x12   : > { %2901 = sst [smem:[#allocation8_spill]] %s2362_s27  ;;  %s39_s1 = sadd.s32 1, %s2370_s29 }
  0x13   : > { %2902 = sst [smem:[#allocation9_spill]] %s2366_s28  ;;  %p40_p0 = scmp.ge.s32.totalorder %s39_s1, 2 }
  0x14   : > { %2903 = sst [smem:[#allocation10_spill]] %s2370_s29  ;;  %s42_s20 = sadd.s32 1, %s2374_s0 }
  0x15   : > { %2904 = sst [smem:[#allocation11_spill]] %s2374_s0  ;;  %p486_p1 = scmp.ne.s32.totalorder %s2358_s26, %s2354_s25 }
  0x16   : > { %2905 = sst [smem:[#allocation12_spill]] %s2378_s30  ;;  %p487_p2 = scmp.eq.s32.totalorder %s1952_s18, 3 }
  0x17   : > { %s2949_s1 = smov (%p40_p0, %s39_s1), 0  ;;  %s2951_s20 = smov (!%p40_p0, %s42_s20), %s2374_s0 }
  0x18   : > { %2906 = sst [smem:[#allocation13_spill]] %s2949_s1  ;;  %p2539_p3 = por %p487_p2, %p486_p1 }
  0x19   : > { %p492_p4 = scmp.ne.s32.totalorder %s2354_s25, %s2350_s24  ;;  %p44_p5 = scmp.ge.s32.totalorder %s2951_s20, 2 }
  0x1a   : > { %s2907_s21 = scalar_select %p2539_p3, 1, 0 }
  0x1b   : > { %p493_p6 = scmp.eq.s32.totalorder %s1953_s19, 3  ;;  %p1956_p7 = scmp.ge.s32.totalorder %s2378_s30, 1 }
  0x1c   : > { %2908 = sst [smem:[#allocation14_spill]] %s2907_s21  ;;  %p614_p8 = scmp.lt.s32.totalorder %s2378_s30, 5 }
  0x1d   : > { %s2953_s20 = smov (%p44_p5, %s2951_s20), 0  ;;  %p2549_p9 = por %p493_p6, %p492_p4 }
  0x1e   : > { %2909 = sst [smem:[#allocation15_spill]] %s2953_s20  ;;  %p615_p10 = pnand %p1956_p7, %p614_p8 }
  0x1f   : > { %s2910_s22 = scalar_select %p2549_p9, 1, 0 }
  0x20   : > { %s473_s23 = ssub.s32 %s2374_s0, %s2953_s20  ;;  %s476_s18 = sadd.s32 1, %s2358_s26 }
  0x21   : > { %2911 = sst [smem:[#allocation16_spill]] %s2910_s22  ;;  %p474_p11 = scmp.eq.s32.totalorder %s473_s23, 0 }
  0x22   : > { %618 = sbr.rel (%p615_p10) target bundleno = 3070 (0xbfe), region = 88  ;;  %p712_p12 = scmp.lt.s32.totalorder (!%p615_p10), %s2366_s28, 1 }
  0x23   : > { %s2557_s1 = scalar_select %p474_p11, %s2358_s26, %s476_s18  }
  0x24   : > { %p716_p13 = scmp.lt.s32.totalorder (!%p615_p10), %s2362_s27, 1  ;;  %s2913_s0 = sld [smem:[#allocation18_spill]] (!%p615_p10) }
  0x25   : > { %2912 = sst [smem:[#allocation17_spill]] %s2557_s1 }
  0x26   : > { %s2916_s3 = sld [smem:[#allocation21_spill]] (!%p615_p10) }
  0x27   : > { %s713_s29 = scalar_select %p712_p12, %s2366_s28, 1 }
  0x28   : > { %s2564_s24 = scalar_select %p716_p13, %s2362_s27, 1 }
  0x29   : > { %s1957_s23 = sshll.u32 %s713_s29, 3  ;;  %s2917_s5 = sld [smem:[#allocation22_spill]] }
  0x2a   : > { %s715_s19 = scalar_lea.vmem %s2913_s0, %s1957_s23  ;;  %s2011_s14 = sshll.u32 %s2564_s24, 4 }
  0x2b   : > { %s2607_s29 = scalar_lea.vmem %s2866_s9, %s2011_s14  ;;  %s751_s20 = scalar_lea.vmem %s2867_s10, %s2564_s24 }
  0x2c   : > { %s2581_s27 = scalar_lea.vmem %s2916_s3, %s2011_s14  ;;  %s759_s17 = scalar_lea.vmem %s2869_s12, %s2564_s24 }
  0x2d   : > { %s2918_s3 = sld [smem:[#allocation25_spill]] }
  0x2e   : > { %s2920_s0 = sld [smem:[#allocation8_spill]] }
  0x2f   : > { %s2590_s26 = scalar_lea.vmem %s2917_s5, %s2011_s14  ;;  %s2014_s5 = sshll.u32 %s2564_s24, 6 }
  0x30   : > { %s2621_s30 = scalar_lea.vmem %s2868_s11, %s2014_s5  ;;  %s2919_s14 = sand.u32 1, %s2354_s25  }
  0x31   : > { %s2630_s15 = scalar_lea.vmem [#allocation3], %s2919_s14 }
  0x33   : > { %s2626_s2 = scalar_lea.vmem %s2918_s3, %s1957_s23 }
  0x34   : > { %p1967_p0 = scmp.ne.s32.totalorder %s2920_s0, 0 }
  0x36   : > { %768 = sbr.rel (%p1967_p0) target bundleno = 61 (0x3d), region = 92 }
  0x3b   : > { %v769_v0 = vld [vmem:[%s715_s19] sm:$0xff]  ;;  %vm770_vm0 = vcmask 261120  }
  0x3c   : > { %771 = vst.msk [vmem:[#allocation2] sm:$0xff] %vm770_vm0, %v769_v0 }
  0x3d PF: > { %vm775_vm1 = vcmask 261120   ;;  %v2242_v8 = vld [vmem:[%s2581_s27 + $0x8] sm:$0xff]   ;;  %v2380_v9 = vmov 0.0   ;;  %vm2381_vm2 = vmmov 0   ;;  %v2243_v10 = vld [vmem:[%s2581_s27] sm:$0xff]   ;;  %s2921_s19 = sld [smem:[#allocation19_spill]]  ;;  %s2925_s13 = scalar_lea.vmem %s2861_s4, %s2564_s24  ;;  %v871_v39 = vlaneseq }
  0x3e   : > { %2052 = vmatprep.subr.bf16.mxu0 %v2380_v9  ;;  %2056 = vmatprep.mubr.msk.bf16.mxu0 %vm2381_vm2, %v2380_v9  ;;  %s2923_s1 = sld [smem:[#allocation20_spill]]  ;;  %v1970_v21 = vld [vmem:[%s2925_s13] ss:$0 sm:$0xff]  ;;  %s2382_s16 = smov 120   ;;  %vm881_vm3 = vcmask 64512   ;;  %vm947_vm5 = vcmask 1043456  }
  0x3f   : > { %2053 = vmatpush3.bf16.msra.mxu0 %v2242_v8  ;;  %2072 = vmatprep.subr.bf16.mxu1 %v2380_v9  ;;  %s2383_s14 = smov 96   ;;  %s2384_s0 = smov 88   ;;  %v872_v40 = vshrl.u32 %v871_v39, 7  ;;  %v874_v41 = vand.u32 127, %v871_v39  ;;  %vm1340_vm6 = vcmask 130048   ;;  %vm1342_vm7 = vcmask 195584  }
  0x40   : > { %2054 = vmatprep.subr.bf16.mxu0 %v2380_v9  ;;  %2074 = vmatprep.mubr.msk.bf16.mxu1 %vm2381_vm2, %v2380_v9  ;;  %s2385_s3 = smov 80   ;;  %s2386_s5 = smov 112  }
  0x41   : > { %vm875_vm4 = vcmp.gt.s32.totalorder %v874_v41, %v872_v40  ;;  %s2389_s23 = smov 64   ;;  %s2390_s18 = smov 56  }
  0x42   : > { %v876_v43 = vsel %vm875_vm4, -1e+09, %v2380_v9  ;;  %s2393_s28 = smov 8   ;;  %s2394_s21 = smov 16  }
  0x43   : > { %v2633_v1 = vld [vmem:[#allocation2] sm:$0xff]  ;;  %2055 = vmatpush3.bf16.msra.mxu0 %v2243_v10  ;;  %s2922_s27 = scalar_lea.vmem %s2921_s19, %s2564_s24  ;;  %s2387_s19 = smov 72  }
  0x44   : > { %v776_v2 = vsel %vm775_vm1, %v2633_v1, 0.0  ;;  %2060 = vmatprep.subr.bf16.mxu0 %v2380_v9  ;;  %v1968_v15 = vld [vmem:[%s2922_s27] ss:$0 sm:$0xff]  ;;  %s2924_s22 = scalar_lea.vmem %s2923_s1, %s2564_s24  ;;  %s2388_s27 = smov 104  }
  0x45   : > { %777 = vadd.xlane.f32.xlu0 %v776_v2  ;;  %v1969_v17 = vld [vmem:[%s2924_s22] ss:$0 sm:$0xff]  ;;  %s2391_s1 = smov 48   ;;  %s2392_s22 = smov 40  }
  0x46   : > { %s2395_s13 = smov 24  }
  0xce   : > { %v778_v3 = vpop.xlane.xlu0 %777 }
  0xcf   : > { %v780_v4 = vmul.f32 0.03125, %v778_v3 }
  0xd1   : > { %v781_v5 = vsub.f32 %v2633_v1, %v780_v4 }
  0xd3   : > { %v782_v6 = vmul.f32 %v781_v5, %v781_v5 }
  0xd5   : > { %v783_v7 = vsel %vm775_vm1, %v782_v6, 0.0 }
  0xd6   : > { %784 = vadd.xlane.f32.xlu0 %v783_v7 }
 0x15f   : > { %v785_v11 = vpop.xlane.xlu0 %784 }
 0x160   : > { %v786_v12 = vmul.f32 0.03125, %v785_v11 }
 0x162   : > { %v787_v13 = vadd.f32 1e-05, %v786_v12 }
 0x164   : > { %2256 = vrsqrt.f32 %v787_v13 }
 0x171   : > { %v2257_v14 = vpop.eup %2256 }
 0x172   : > { %v789_v16 = vmul.f32 %v2257_v14, %v781_v5 }
 0x174   : > { %v796_v18 = vmul.f32 %v1968_v15, %v789_v16 }
 0x176   : > { %v803_v19 = vadd.f32 %v1969_v17, %v796_v18 }
 0x178   : > { %v804_v20 = vpack.c.bf16 %v803_v19, %v803_v19 }
 0x17a   : > { %2057 = vmatmul.mubr.msk.bf16.vlgmr.msra.gmra.mxu0 %vm775_vm1, %v804_v20 }
 0x17b   : > { %2062 = vmatprep.mubr.msk.bf16.mxu0 %vm2381_vm2, %v2380_v9 }
 0x23a   : > { %v865_v22 = vpop.f32.mrf.mxu0 }
 0x23b   : > { %v866_v23 = vadd.f32 %v1970_v21, %v865_v22 }
 0x23c   : > { %v2058_v24 = vpop.f32.mrf.mxu0 }
 0x23d   : > { %v2667_v25 = vpack.c.bf16 %v866_v23, %v866_v23 }
 0x23e   : > { %v868_v26 = vpop.f32.mrf.mxu0 }
 0x23f   : > { %991 = vrot.lane.b32.xlu0 %v2667_v25, %s2382_s16  ;;  %879 = vrot.lane.b32.xlu1 %v2667_v25, %s2383_s14  ;;  %s2926_s14 = scalar_lea.vmem %s2863_s6, %s2564_s24 }
 0x240   : > { %v2059_v27 = vpop.f32.mrf.mxu0 }
 0x243   : > { %993 = vrot.lane.b32.xlu1 %v2667_v25, %s2384_s0 }
 0x247   : > { %1105 = vrot.lane.b32.xlu1 %v2667_v25, %s2385_s3 }
 0x24b   : > { %1103 = vrot.lane.b32.xlu1 %v2667_v25, %s2386_s5  ;;  %s2927_s5 = scalar_lea.vmem %s2864_s7, %s2564_s24 }
 0x24f   : > { %1217 = vrot.lane.b32.xlu1 %v2667_v25, %s2387_s19 }
 0x253   : > { %1215 = vrot.lane.b32.xlu1 %v2667_v25, %s2388_s27 }
 0x2b1   : > { %v880_v28 = vpop.permute.xlu1 %879  ;;  %v992_v33 = vpop.permute.xlu0 %991 }
 0x2b2   : > { %v886_v29 = vsel %vm881_vm3, %v880_v28, 0 }
 0x2b3   : > { %2061 = vmatpush3.bf16.xpose.msra.mxu0 %v886_v29 }
 0x2b4   : > { %2066 = vmatprep.subr.bf16.mxu0 %v2380_v9 }
 0x2b5   : > { %v994_v30 = vpop.permute.xlu1 %993 }
 0x2b6   : > { %v999_v31 = vsel %vm881_vm3, %v994_v30, 0 }
 0x2b7   : > { %2073 = vmatpush3.bf16.xpose.msra.mxu1 %v999_v31 }
 0x2b8   : > { %2084 = vmatprep.subr.bf16.mxu1 %v2380_v9 }
 0x2b9   : > { %v1106_v32 = vpop.permute.xlu1 %1105 }
 0x2ba   : > { %2063 = vmatmul.mubr.msk.bf16.vlgmr.msra.gmra.mxu0 %vm881_vm3, %v2667_v25  ;;  %v1111_v35 = vsel %vm881_vm3, %v1106_v32, 0 }
 0x2bb   : > { %2068 = vmatprep.mubr.msk.bf16.mxu0 %vm2381_vm2, %v2380_v9 }
 0x2bd   : > { %v1104_v34 = vpop.permute.xlu1 %1103 }
 0x2be   : > { %2075 = vmatmul.mubr.msk.bf16.vlgmr.msra.gmra.mxu1 %vm881_vm3, %v992_v33 }
 0x2bf   : > { %2085 = vmatpush3.bf16.xpose.msra.mxu1 %v1111_v35  ;;  %2086 = vmatprep.mubr.msk.bf16.mxu1 %vm2381_vm2, %v2380_v9 }
 0x2c0   : > { %2096 = vmatprep.subr.bf16.mxu1 %v2380_v9 }
 0x2c1   : > { %v1218_v36 = vpop.permute.xlu1 %1217 }
 0x2c2   : > { %v1223_v37 = vsel %vm881_vm3, %v1218_v36, 0 }
 0x2c5   : > { %v1216_v38 = vpop.permute.xlu1 %1215 }
 0x2c6   : > { %2087 = vmatmul.mubr.msk.bf16.vlgmr.msra.gmra.mxu1 %vm881_vm3, %v1104_v34 }
 0x2c7   : > { %2097 = vmatpush3.bf16.xpose.msra.mxu1 %v1223_v37  ;;  %2098 = vmatprep.mubr.msk.bf16.mxu1 %vm2381_vm2, %v2380_v9 }
 0x2c8   : > { %2108 = vmatprep.subr.bf16.mxu1 %v2380_v9 }
 0x2ce   : > { %2099 = vmatmul.mubr.msk.bf16.vlgmr.msra.gmra.mxu1 %vm881_vm3, %v1216_v38 }
 0x2cf   : > { %2112 = vmatprep.mubr.msk.bf16.mxu1 %vm2381_vm2, %v2380_v9 }
 0x37a   : > { %v922_v42 = vpop.f32.mrf.mxu0 }
 0x37b   : > { %v928_v44 = vmul.f32 0.35355338, %v922_v42 }
 0x37c   : > { %v2064_v45 = vpop.f32.mrf.mxu0 }
 0x37d   : > { %v929_v46 = vadd.f32 %v928_v44, %v876_v43 }
 0x37e   : > { %v925_v47 = vpop.f32.mrf.mxu0  ;;  %v1035_v48 = vpop.f32.mrf.mxu1 }
 0x37f   : > { %v1041_v49 = vmul.f32 0.35355338, %v1035_v48  ;;  %v930_v50 = vsel %vm881_vm3, %v929_v46, -inf }
 0x380   : > { %v2076_v51 = vpop.f32.mrf.mxu1  ;;  %931 = vmax.xlane.f32.xlu1 %v930_v50  ;;  %v2065_v52 = vpop.f32.mrf.mxu0 }
 0x381   : > { %v1042_v53 = vadd.f32 %v1041_v49, %v876_v43 }
 0x382   : > { %v1038_v54 = vpop.f32.mrf.mxu1 }
 0x383   : > { %v1043_v55 = vsel %vm881_vm3, %v1042_v53, -inf }
 0x384   : > { %1044 = vmax.xlane.f32.xlu0 %v1043_v55  ;;  %v2077_v56 = vpop.f32.mrf.mxu1 }
 0x386   : > { %v1147_v57 = vpop.f32.mrf.mxu1 }
 0x387   : > { %v1153_v58 = vmul.f32 0.35355338, %v1147_v57 }
 0x388   : > { %v2088_v59 = vpop.f32.mrf.mxu1 }
 0x389   : > { %v1154_v60 = vadd.f32 %v1153_v58, %v876_v43 }
 0x38a   : > { %v1150_v61 = vpop.f32.mrf.mxu1 }
 0x38b   : > { %v1155_v62 = vsel %vm881_vm3, %v1154_v60, -inf  ;;  %v2244_v61 = vld [vmem:[%s2590_s26 + $0x8] sm:$0xff]  }
 0x38c   : > { %v2089_v63 = vpop.f32.mrf.mxu1  ;;  %1156 = vmax.xlane.f32.xlu1 %v1155_v62  ;;  %2109 = vmatpush3.bf16.msra.mxu1 %v2244_v61  ;;  %v2245_v62 = vld [vmem:[%s2590_s26] sm:$0xff]  }
 0x38d   : > { %2110 = vmatprep.subr.bf16.mxu1 %v2380_v9  ;;  %v2001_v61 = vld [vmem:[%s759_s17] ss:$0 sm:$0xff] }
 0x38e   : > { %v1259_v0 = vpop.f32.mrf.mxu1 }
 0x38f   : > { %v1265_v2 = vmul.f32 0.35355338, %v1259_v0 }
 0x390   : > { %v2100_v3 = vpop.f32.mrf.mxu1  ;;  %2111 = vmatpush3.bf16.msra.mxu1 %v2245_v62 }
 0x391   : > { %v1266_v4 = vadd.f32 %v1265_v2, %v876_v43  ;;  %2124 = vmatprep.subr.bf16.mxu1 %v2380_v9 }
 0x392   : > { %v1262_v5 = vpop.f32.mrf.mxu1 }
 0x393   : > { %v1267_v6 = vsel %vm881_vm3, %v1266_v4, -inf }
 0x394   : > { %1268 = vmax.xlane.f32.xlu0 %v1267_v6  ;;  %v2101_v7 = vpop.f32.mrf.mxu1 }
 0x409   : > { %v932_v8 = vpop.xlane.xlu1 %931 }
 0x40a   : > { %v933_v10 = vsub.f32 %v929_v46, %v932_v8 }
 0x40c   : > { %v934_v11 = vmul.f32 1.442695, %v933_v10 }
 0x40d   : > { %v1045_v12 = vpop.xlane.xlu0 %1044 }
 0x40e   : > { %2258 = vpow2.f32 %v934_v11  ;;  %v1046_v13 = vsub.f32 %v1042_v53, %v1045_v12 }
 0x410   : > { %v1047_v14 = vmul.f32 1.442695, %v1046_v13 }
 0x412   : > { %2260 = vpow2.f32 %v1047_v14 }
 0x415   : > { %v1157_v24 = vpop.xlane.xlu1 %1156 }
 0x416   : > { %v1158_v26 = vsub.f32 %v1154_v60, %v1157_v24 }
 0x418   : > { %v1159_v27 = vmul.f32 1.442695, %v1158_v26 }
 0x41b   : > { %v2259_v15 = vpop.eup %2258 }
 0x41c   : > { %v936_v16 = vsel %vm881_vm3, %v2259_v15, 0.0 }
 0x41d   : > { %v1269_v17 = vpop.xlane.xlu0 %1268  ;;  %937 = vadd.xlane.f32.xlu1 %v936_v16 }
 0x41e   : > { %v1270_v18 = vsub.f32 %v1266_v4, %v1269_v17  ;;  %v1985_v17 = vld [vmem:[%s2926_s14] ss:$0 sm:$0xff] }
 0x41f   : > { %v2261_v19 = vpop.eup %2260 }
 0x420   : > { %v1271_v20 = vmul.f32 1.442695, %v1270_v18  ;;  %v1049_v21 = vsel %vm881_vm3, %v2261_v19, 0.0 }
 0x421   : > { %1050 = vadd.xlane.f32.xlu0 %v1049_v21 }
 0x422   : > { %2262 = vpow2.f32 %v1271_v20 }
 0x423   : > { %2264 = vpow2.f32 %v1159_v27 }
 0x42e   : > { %942 = vrot.lane.b32.xlu1 %v2667_v25, %s2389_s23 }
 0x42f   : > { %v2263_v22 = vpop.eup %2262 }
 0x430   : > { %v1273_v23 = vsel %vm881_vm3, %v2263_v22, 0.0  ;;  %v2265_v28 = vpop.eup %2264 }
 0x431   : > { %1274 = vadd.xlane.f32.xlu0 %v1273_v23  ;;  %v1161_v29 = vsel %vm881_vm3, %v2265_v28, 0.0 }
 0x447   : > { %1055 = vrot.lane.b32.xlu0 %v2667_v25, %s2390_s18 }
 0x452   : > { %1162 = vadd.xlane.f32.xlu1 %v1161_v29 }
 0x463   : > { %1167 = vrot.lane.b32.xlu1 %v2667_v25, %s2391_s1 }
 0x467   : > { %1279 = vrot.lane.b32.xlu1 %v2667_v25, %s2392_s22 }
 0x4a6   : > { %v938_v30 = vpop.xlane.xlu1 %937 }
 0x4a7   : > { %2266 = vrcp.f32 %v938_v30  ;;  %v2247_v30 = vld [vmem:[%s2607_s29] sm:$0xff]  }
 0x4aa   : > { %v1051_v31 = vpop.xlane.xlu0 %1050  ;;  %v943_v32 = vpop.permute.xlu1 %942 }
 0x4ab   : > { %v949_v33 = vsel %vm947_vm5, %v943_v32, 0  ;;  %2268 = vrcp.f32 %v1051_v31 }
 0x4ac   : > { %2067 = vmatpush3.bf16.msra.mxu0 %v949_v33 }
 0x4ad   : > { %2078 = vmatprep.subr.bf16.mxu0 %v2380_v9 }
 0x4b4   : > { %v2267_v34 = vpop.eup %2266 }
 0x4b5   : > { %v940_v35 = vmul.f32 %v2267_v34, %v2259_v15 }
 0x4b7   : > { %v941_v36 = vpack.c.bf16 %v940_v35, %v940_v35  ;;  %v1986_v35 = vld [vmem:[%s2927_s5] ss:$0 sm:$0xff] }
 0x4b8   : > { %v2269_v37 = vpop.eup %2268 }
 0x4b9   : > { %2069 = vmatmul.mubr.msk.bf16.vlgmr.msra.gmra.mxu0 %vm881_vm3, %v941_v36  ;;  %v1053_v25 = vmul.f32 %v2269_v37, %v2261_v19 }
 0x4ba   : > { %v1275_v38 = vpop.xlane.xlu0 %1274  ;;  %2080 = vmatprep.mubr.msk.bf16.mxu0 %vm2381_vm2, %v2380_v9 }
 0x4bb   : > { %v1054_v41 = vpack.c.bf16 %v1053_v25, %v1053_v25 }
 0x4be   : > { %v1056_v39 = vpop.permute.xlu0 %1055 }
 0x4bf   : > { %v1061_v40 = vsel %vm947_vm5, %v1056_v39, 0 }
 0x4c0   : > { %2079 = vmatpush3.bf16.msra.mxu0 %v1061_v40  ;;  %v2248_v40 = vld [vmem:[%s2621_s30 + $0x38] sm:$0xff]  }
 0x4c1   : > { %2090 = vmatprep.subr.bf16.mxu0 %v2380_v9 }
 0x4c3   : > { %2081 = vmatmul.mubr.msk.bf16.vlgmr.msra.gmra.mxu0 %vm881_vm3, %v1054_v41  ;;  %v2249_v41 = vld [vmem:[%s2621_s30 + $0x30] sm:$0xff]  }
 0x4c4   : > { %2092 = vmatprep.mubr.msk.bf16.mxu0 %vm2381_vm2, %v2380_v9 }
 0x4db   : > { %v1163_v42 = vpop.xlane.xlu1 %1162 }
 0x4dc   : > { %2270 = vrcp.f32 %v1163_v42  ;;  %v2250_v42 = vld [vmem:[%s2621_s30 + $0x28] sm:$0xff]  }
 0x4dd   : > { %2272 = vrcp.f32 %v1275_v38 }
 0x4df   : > { %v1168_v43 = vpop.permute.xlu1 %1167 }
 0x4e0   : > { %v1173_v44 = vsel %vm947_vm5, %v1168_v43, 0  ;;  %v2251_v43 = vld [vmem:[%s2621_s30 + $0x20] sm:$0xff]  }
 0x4e1   : > { %2091 = vmatpush3.bf16.msra.mxu0 %v1173_v44  ;;  %v2252_v44 = vld [vmem:[%s2621_s30 + $0x18] sm:$0xff]  }
 0x4e2   : > { %2102 = vmatprep.subr.bf16.mxu0 %v2380_v9 }
 0x4e3   : > { %v1280_v47 = vpop.permute.xlu1 %1279 }
 0x4e4   : > { %v1285_v50 = vsel %vm947_vm5, %v1280_v47, 0  ;;  %v2255_v47 = vld [vmem:[%s2621_s30] sm:$0xff]  }
 0x4e9   : > { %v2271_v45 = vpop.eup %2270 }
 0x4ea   : > { %v1165_v46 = vmul.f32 %v2271_v45, %v2265_v28  ;;  %v2273_v49 = vpop.eup %2272  ;;  %v2253_v45 = vld [vmem:[%s2621_s30 + $0x10] sm:$0xff]  }
 0x4eb   : > { %v1277_v51 = vmul.f32 %v2273_v49, %v2263_v22 }
 0x4ec   : > { %v1166_v48 = vpack.c.bf16 %v1165_v46, %v1165_v46  ;;  %v2254_v46 = vld [vmem:[%s2621_s30 + $0x8] sm:$0xff]  }
 0x4ed   : > { %v1278_v52 = vpack.c.bf16 %v1277_v51, %v1277_v51 }
 0x4ee   : > { %2093 = vmatmul.mubr.msk.bf16.vlgmr.msra.gmra.mxu0 %vm881_vm3, %v1166_v48  ;;  %v1988_v48 = vld [vmem:[%s751_s20] ss:$0 sm:$0xff]  ;;  %s2929_s20 = sld [smem:[#allocation8_spill]] }
 0x4ef   : > { %2103 = vmatpush3.bf16.msra.mxu0 %v1285_v50  ;;  %2104 = vmatprep.mubr.msk.bf16.mxu0 %vm2381_vm2, %v2380_v9 }
 0x4f0   : > { %2116 = vmatprep.subr.bf16.mxu0 %v2380_v9 }
 0x4f4   : > { %p2002_p1 = scmp.ne.s32.totalorder %s2929_s20, 1 }
 0x4f5   : > { %s2930_s22 = sld [smem:[#allocation26_spill]] (!%p2002_p1) }
 0x4f6   : > { %2105 = vmatmul.mubr.msk.bf16.vlgmr.msra.gmra.mxu0 %vm881_vm3, %v1278_v52  ;;  %s2931_s26 = sld [smem:[#allocation23_spill]] (!%p2002_p1) }
 0x4f7   : > { %2120 = vmatprep.mubr.msk.bf16.mxu0 %vm2381_vm2, %v2380_v9  ;;  %s2932_s0 = sld [smem:[#allocation24_spill]] (!%p2002_p1) }
 0x579   : > { %v985_v53 = vpop.f32.mrf.mxu0 }
 0x57b   : > { %v2070_v54 = vpop.f32.mrf.mxu0 }
 0x57d   : > { %v988_v55 = vpop.f32.mrf.mxu0 }
 0x57f   : > { %v2071_v56 = vpop.f32.mrf.mxu0 }
 0x583   : > { %v1097_v57 = vpop.f32.mrf.mxu0 }
 0x584   : > { %1328 = vrot.lane.b32.xlu0 %v1097_v57, %s2393_s28 }
 0x585   : > { %v2082_v58 = vpop.f32.mrf.mxu0 }
 0x587   : > { %v1100_v59 = vpop.f32.mrf.mxu0 }
 0x589   : > { %v2083_v60 = vpop.f32.mrf.mxu0 }
 0x5ae   : > { %v1209_v63 = vpop.f32.mrf.mxu0 }
 0x5af   : > { %1332 = vrot.lane.b32.xlu1 %v1209_v63, %s2394_s21 }
 0x5b0   : > { %v2094_v0 = vpop.f32.mrf.mxu0 }
 0x5b2   : > { %v1212_v2 = vpop.f32.mrf.mxu0 }
 0x5b4   : > { %v2095_v3 = vpop.f32.mrf.mxu0 }
 0x5b6   : > { %v1321_v4 = vpop.f32.mrf.mxu0 }
 0x5b7   : > { %1336 = vrot.lane.b32.xlu0 %v1321_v4, %s2395_s13 }
 0x5b8   : > { %v2106_v5 = vpop.f32.mrf.mxu0 }
 0x5ba   : > { %v1324_v6 = vpop.f32.mrf.mxu0 }
 0x5bc   : > { %v2107_v7 = vpop.f32.mrf.mxu0 }
 0x5f6   : > { %v1329_v8 = vpop.permute.xlu0 %1328 }
 0x5f7   : > { %v1339_v11 = vsel %vm881_vm3, %v985_v53, %v1329_v8 }
 0x621   : > { %v1333_v10 = vpop.permute.xlu1 %1332 }
 0x622   : > { %v1341_v12 = vsel %vm1340_vm6, %v1339_v11, %v1333_v10 }
 0x629   : > { %v1337_v13 = vpop.permute.xlu0 %1336 }
 0x62a   : > { %v1343_v14 = vsel %vm1342_vm7, %v1341_v12, %v1337_v13 }
 0x62b   : > { %v1344_v15 = vpack.c.bf16 %v1343_v14, %v1343_v14 }
 0x62d   : > { %2113 = vmatmul.mubr.msk.bf16.vlgmr.msra.gmra.mxu1 %vm775_vm1, %v1344_v15 }
 0x62e   : > { %2140 = vmatprep.mubr.msk.bf16.mxu1 %vm2381_vm2, %v2380_v9  ;;  %2125 = vmatpush3.bf16.msra.mxu1 %v2248_v40 }
 0x62f   : > { %2126 = vmatprep.subr.bf16.mxu1 %v2380_v9 }
 0x632   : > { %2127 = vmatpush3.bf16.msra.mxu1 %v2249_v41 }
 0x633   : > { %2128 = vmatprep.subr.bf16.mxu1 %v2380_v9 }
 0x636   : > { %2129 = vmatpush3.bf16.msra.mxu1 %v2250_v42 }
 0x637   : > { %2130 = vmatprep.subr.bf16.mxu1 %v2380_v9 }
 0x63a   : > { %2131 = vmatpush3.bf16.msra.mxu1 %v2251_v43 }
 0x63b   : > { %2132 = vmatprep.subr.bf16.mxu1 %v2380_v9 }
 0x63e   : > { %2133 = vmatpush3.bf16.msra.mxu1 %v2252_v44 }
 0x63f   : > { %2134 = vmatprep.subr.bf16.mxu1 %v2380_v9 }
 0x642   : > { %2135 = vmatpush3.bf16.msra.mxu1 %v2253_v45 }
 0x643   : > { %2136 = vmatprep.subr.bf16.mxu1 %v2380_v9 }
 0x646   : > { %2137 = vmatpush3.bf16.msra.mxu1 %v2254_v46 }
 0x647   : > { %2138 = vmatprep.subr.bf16.mxu1 %v2380_v9 }
 0x64a   : > { %2139 = vmatpush3.bf16.msra.mxu1 %v2255_v47 }
 0x6ed   : > { %v1398_v16 = vpop.f32.mrf.mxu1 }
 0x6ee   : > { %v1404_v18 = vadd.f32 %v1398_v16, %v2633_v1  ;;  %v2246_v1 = vld [vmem:[%s2607_s29 + $0x8] sm:$0xff]   ;;  %s2928_s29 = scalar_lea.vmem %s2865_s8, %s2564_s24 }
 0x6ef   : > { %v2114_v19 = vpop.f32.mrf.mxu1  ;;  %2117 = vmatpush3.bf16.msra.mxu0 %v2246_v1  ;;  %v1987_v37 = vld [vmem:[%s2928_s29] ss:$0 sm:$0xff] }
 0x6f0   : > { %v2744_v20 = vadd.f32 %v1985_v17, %v1404_v18  ;;  %2118 = vmatprep.subr.bf16.mxu0 %v2380_v9 }
 0x6f1   : > { %v1401_v21 = vpop.f32.mrf.mxu1 }
 0x6f2   : > { %v1415_v22 = vsel %vm775_vm1, %v2744_v20, 0.0 }
 0x6f3   : > { %1416 = vadd.xlane.f32.xlu1 %v1415_v22  ;;  %v2115_v23 = vpop.f32.mrf.mxu1  ;;  %2119 = vmatpush3.bf16.msra.mxu0 %v2247_v30 }
 0x77c   : > { %v1417_v24 = vpop.xlane.xlu1 %1416 }
 0x77d   : > { %v1418_v26 = vmul.f32 0.03125, %v1417_v24 }
 0x77f   : > { %v1419_v27 = vsub.f32 %v2744_v20, %v1418_v26 }
 0x781   : > { %v1420_v28 = vmul.f32 %v1419_v27, %v1419_v27 }
 0x783   : > { %v1421_v29 = vsel %vm775_vm1, %v1420_v28, 0.0 }
 0x784   : > { %1422 = vadd.xlane.f32.xlu0 %v1421_v29 }
 0x80d   : > { %v1423_v31 = vpop.xlane.xlu0 %1422 }
 0x80e   : > { %v1424_v32 = vmul.f32 0.03125, %v1423_v31 }
 0x810   : > { %v1425_v33 = vadd.f32 1e-05, %v1424_v32 }
 0x812   : > { %2274 = vrsqrt.f32 %v1425_v33 }
 0x81f   : > { %v2275_v34 = vpop.eup %2274 }
 0x820   : > { %v1427_v36 = vmul.f32 %v2275_v34, %v1419_v27 }
 0x822   : > { %v1434_v38 = vmul.f32 %v1986_v35, %v1427_v36 }
 0x824   : > { %v1441_v25 = vadd.f32 %v1987_v37, %v1434_v38 }
 0x826   : > { %v1442_v39 = vpack.c.bf16 %v1441_v25, %v1441_v25 }
 0x828   : > { %2121 = vmatmul.mubr.msk.bf16.vlgmr.msra.gmra.mxu0 %vm775_vm1, %v1442_v39 }
 0x8e8   : > { %v1503_v49 = vpop.f32.mrf.mxu0 }
 0x8e9   : > { %v1504_v50 = vadd.f32 %v1988_v48, %v1503_v49 }
 0x8ea   : > { %v2122_v51 = vpop.f32.mrf.mxu0 }
 0x8eb   : > { %v1992_v52 = vmul.f32 -1.702, %v1504_v50 }
 0x8ec   : > { %v1506_v53 = vpop.f32.mrf.mxu0 }
 0x8ed   : > { %v1511_v54 = vmul.f32 1.442695, %v1992_v52 }
 0x8ee   : > { %v2123_v55 = vpop.f32.mrf.mxu0 }
 0x8ef   : > { %2276 = vpow2.f32 %v1511_v54 }
 0x8fc   : > { %v2277_v56 = vpop.eup %2276 }
 0x8fd   : > { %v1513_v57 = vadd.f32 1.0, %v2277_v56 }
 0x8ff   : > { %2278 = vrcp.f32 %v1513_v57 }
 0x90c   : > { %v2279_v9 = vpop.eup %2278 }
 0x90d   : > { %v1516_v58 = vmul.f32 %v2279_v9, %v1504_v50 }
 0x90f   : > { %v1517_v59 = vpack.c.bf16 %v1516_v58, %v1516_v58 }
 0x911   : > { %2141 = vmatmul.mubr.bf16.vlgmr.msra.gmra.mxu1 %v1517_v59 }
 0x9d1   : > { %v1616_v60 = vpop.f32.mrf.mxu1 }
 0x9d2   : > { %v1622_v62 = vadd.f32 %v1616_v60, %v2744_v20 }
 0x9d3   : > { %v2142_v63 = vpop.f32.mrf.mxu1  ;;  %1635 = sbr.rel (%p2002_p1) target bundleno = 3044 (0xbe4), region = 96 }
 0x9d4   : > { %v1630_v0 = vadd.f32 %v2001_v61, %v1622_v62 }
 0x9d5   : > { %v1619_v2 = vpop.f32.mrf.mxu1 }
 0x9d6   : > { %1631 = vst.msk [vmem:[#allocation2] sm:$0xff] %vm775_vm1, %v1630_v0 }
 0x9d7   : > { %v2143_v3 = vpop.f32.mrf.mxu1 }
 0x9d8   : > { %v1638_v4 = vsel %vm775_vm1, %v1630_v0, 0.0  ;;  %v1665_v5 = vld [vmem:[%s2626_s2] sm:$0xff]  ;;  %v2396_v6 = vmov 0   ;;  %v2282_v13 = vld [vmem:[%s2930_s22 + $0x8] sm:$0xff]   ;;  %v2397_v14 = vmov 0.0   ;;  %vm2398_vm8 = vmmov 0  }
 0x9d9   : > { %1639 = vadd.xlane.f32.xlu0 %v1638_v4  ;;  %2280 = vset.pattern.permute.xlu1 %v2396_v6  ;;  %v2283_v15 = vld [vmem:[%s2930_s22] sm:$0xff]   ;;  %vm1739_vm9 = vcmask 253952  }
 0x9da   : > { %2281 = vset.pattern.permute.xlu0 %v2396_v6  ;;  %1668 = vperm.xlu1 %2280, %v1665_v5   ;;  %v2003_v20 = vld [vmem:[%s2931_s26] ss:$0 sm:$0xff] }
 0x9db   : > { %2144 = vmatprep.subr.bf16.mxu0 %v2397_v14  ;;  %2148 = vmatprep.mubr.msk.bf16.mxu0 %vm2398_vm8, %v2397_v14  ;;  %v2004_v22 = vld [vmem:[%s2932_s0] ss:$0 sm:$0xff] }
 0x9dc   : > { %2145 = vmatpush3.bf16.msra.mxu0 %v2282_v13 }
 0x9dd   : > { %2146 = vmatprep.subr.bf16.mxu0 %v2397_v14 }
 0x9e0   : > { %2147 = vmatpush3.bf16.msra.mxu0 %v2283_v15 }
 0xa55   : > { %v1669_v24 = vpop.permute.xlu1 %1668 }
 0xa62   : > { %v1640_v7 = vpop.xlane.xlu0 %1639 }
 0xa63   : > { %v1641_v8 = vmul.f32 0.03125, %v1640_v7 }
 0xa65   : > { %v1642_v10 = vsub.f32 %v1630_v0, %v1641_v8 }
 0xa67   : > { %v1643_v11 = vmul.f32 %v1642_v10, %v1642_v10 }
 0xa69   : > { %v1644_v12 = vsel %vm775_vm1, %v1643_v11, 0.0 }
 0xa6a   : > { %1645 = vadd.xlane.f32.xlu0 %v1644_v12 }
 0xaf3   : > { %v1646_v16 = vpop.xlane.xlu0 %1645 }
 0xaf4   : > { %v1647_v17 = vmul.f32 0.03125, %v1646_v16 }
 0xaf6   : > { %v1648_v18 = vadd.f32 1e-05, %v1647_v17 }
 0xaf8   : > { %2284 = vrsqrt.f32 %v1648_v18 }
 0xb05   : > { %v2285_v19 = vpop.eup %2284 }
 0xb06   : > { %v1650_v21 = vmul.f32 %v2285_v19, %v1642_v10 }
 0xb08   : > { %v1657_v23 = vmul.f32 %v2003_v20, %v1650_v21 }
 0xb0a   : > { %v1664_v26 = vadd.f32 %v2004_v22, %v1657_v23 }
 0xb0c   : > { %v1671_v27 = vmul.f32 %v1669_v24, %v1664_v26 }
 0xb0e   : > { %v1672_v28 = vsel %vm775_vm1, %v1671_v27, 0.0 }
 0xb0f   : > { %v1673_v29 = vrot.slane %v1672_v28, 4 }
 0xb11   : > { %v1674_v1 = vadd.f32 %v1673_v29, %v1672_v28 }
 0xb13   : > { %v1675_v30 = vrot.slane %v1674_v1, 2 }
 0xb15   : > { %v1676_v31 = vadd.f32 %v1675_v30, %v1674_v1 }
 0xb17   : > { %v1677_v32 = vrot.slane %v1676_v31, 1 }
 0xb19   : > { %v1678_v33 = vadd.f32 %v1677_v32, %v1676_v31 }
 0xb1b   : > { %v1679_v34 = vpack.c.bf16 %v1678_v33, %v1678_v33 }
 0xb1d   : > { %2149 = vmatmul.mubr.msk.bf16.vlgmr.msra.gmra.mxu0 %vm775_vm1, %v1679_v34 }
 0xbdd   : > { %v1733_v35 = vpop.f32.mrf.mxu0 }
 0xbde   : > { %1740 = vst.msk [vmem:[%s2630_s15] sm:$0x1] %vm1739_vm9, %v1733_v35 }
 0xbdf   : > { %v2150_v36 = vpop.f32.mrf.mxu0 }
 0xbe1   : > { %v1736_v37 = vpop.f32.mrf.mxu0 }
 0xbe3   : > { %v2151_v38 = vpop.f32.mrf.mxu0 }
 0xbe4 PF: > { %s2933_s3 = sld [smem:[#allocation9_spill]]  ;;  %s1754_s30 = sshll.u32 %s2630_s15, 4  ;;  %s1755_s30 = int_to_ptr.vmem [resolvable:$true] %s1754_s30 }
 0xbe5   : > { %s2935_s23 = sld [smem:[#allocation27_spill]]  ;;  %s2936_s1 = sand.u32 1, %s2354_s25  }
 0xbe6   : > { %s1742_s20 = scalar_lea.sflag [#allocation4], %s2936_s1  ;;  %s2286_s24 = scalar_lea.vmem %s1755_s30, 16 }
 0xbe7   : > { %p2287_p2 = scmp.ne.s32.totalorder %s1755_s30, %s2286_s24  ;;  %s2399_s17 = smov [#allocation3]  }
 0xbe8   : > { %s2290_s2 = sshll.u32 %s2399_s17, 4  ;;  %s2291_s2 = int_to_ptr.vmem [resolvable:$false] %s2290_s2 }
 0xbe9   : > { %p2288_p4 = pnand %p2287_p2, %p2539_p3  ;;  %s2292_s28 = scalar_lea.vmem %s2291_s2, 32 }
 0xbea   : > { %s2008_s19 = sshll.u32 %s2933_s3, 4  ;;  %p2293_p6 = scmp.lt.s32.totalorder %s1755_s30, %s2291_s2 }
 0xbeb   : > { %s1752_s18 = scalar_lea.hbm %s2935_s23, %s2008_s19  ;;  %p2289_p5 = pneg %p2288_p4 }
 0xbec   : > { %p2294_p7 = scmp.lt.s32.totalorder %s2292_s28, %s2286_s24 }
 0xbee   : > { %p2295_p8 = por %p2294_p7, %p2293_p6 }
 0xbf0   : > { %p2296_p10 = pnand %p2295_p8, %p2289_p5 }
 0xbf2   : > { %2299 = shalt.err (!%p2296_p10)
}
 0xbf3   : > { %s2300_s21 = scalar_lea.hbm %s1752_s18, 16  ;;  %s2304_s26 = scalar_lea.hbm %s2935_s23, 32 }
 0xbf4   : > { %p2301_p11 = scmp.ne.s32.totalorder %s1752_s18, %s2300_s21  ;;  %p2305_p0 = scmp.lt.s32.totalorder %s1752_s18, %s2935_s23 }
 0xbf5   : > { %p2306_p1 = scmp.lt.s32.totalorder %s2304_s26, %s2300_s21 }
 0xbf6   : > { %p2302_p12 = pnand %p2301_p11, %p2539_p3 }
 0xbf7   : > { %p2307_p2 = por %p2306_p1, %p2305_p0 }
 0xbf8   : > { %p2303_p13 = pneg %p2302_p12 }
 0xbfa   : > { %p2308_p4 = pnand %p2307_p2, %p2303_p13 }
 0xbfc   : > { %2311 = shalt.err (!%p2308_p4)
}
 0xbfd   : > { %2152 = dma.vmem_to_hbm [thread:$0]  (%p2539_p3), %s1755_s30, 16, %s1752_s18, %s1742_s20  }
 0xbfe PF: > { %s2937_s0 = sld [smem:[#allocation12_spill]] }
 0xbff   : > { %s2938_s3 = sld [smem:[#allocation6_spill]] }
 0xc04   : > { %p2158_p5 = scmp.ge.s32.totalorder %s2937_s0, 2 }
 0xc05   : > { %s1766_s27 = sand.u32 1, %s2938_s3  }
 0xc06   : > { %p2155_p6 = pnand %p2158_p5, %p2549_p9  ;;  %s1767_s29 = scalar_lea.sflag [#allocation4], %s1766_s27 }
 0xc08   : > { %p2156_p7 = pneg %p2155_p6 }
 0xc0a   : > { %2345 = dma.done.wait (%p2156_p7), %s1767_s29, 16  }
 0xc0b   : > { %2347 = vsyncadd (%p2156_p7), %s1767_s29, 4294967280  ;;  %s30_s30 = sadd.s32 1, %s2937_s0   ;;  %s2940_s1 = sld [smem:[#allocation7_spill]] }
 0xc0c   : > { %p27_p8 = scmp.ge.s32.totalorder %s30_s30, 6   ;;  %s2941_s26 = sld [smem:[#allocation17_spill]] }
 0xc0d   : > { %s2942_s27 = sld [smem:[#allocation10_spill]]  ;;  %s2946_s24 = smov %s2354_s25 }
 0xc0e   : > { %s2943_s28 = sld [smem:[#allocation11_spill]]  ;;  %29 = sbr.rel (!%p27_p8) target bundleno = 16 (0x10), region = 170 }
 0xc0f   : > { %s2944_s29 = sld [smem:[#allocation13_spill]] }
 0xc10   : > { %s2945_s0 = sld [smem:[#allocation15_spill]] }
 0xc11   : > { %s2947_s25 = smov %s2940_s1 }
 0xc13   :  { %1771 = vsyncpa [#allocation4], 1 }
 0xc14   :  { %1773 = vsyncpa [#allocation4 + $0x1], 1 }

</bundles_post_ra>
